<compile_context>
chip_gen: v6e
topology: v6e:2x2x1
jax: 0.10.0
libtpu: 0.0.40
codegen_flags: <defaults>
</compile_context>

<pallas_src>
import functools

import jax
import jax.numpy as jnp
import numpy as np
from jax.experimental import pallas as pl
from jax.experimental.pallas import tpu as pltpu

NEG_INF = -1e30  # off-edge fill folded into s_edge; exp(alpha * NEG_INF) == 0


# ----------------------------- Pallas kernel -----------------------------

def fused_gat_kernel(x_ref, w_hops_ref, w_out_ref, a1_ref, a2_ref, sedge_hbm,
                     o_ref, h_scr, sbuf, sem,
                     *, alpha, n_hops, n_heads, hid, in_feats, out_pad):
    """Entire GraphModel attention stack in one kernel.

    x_ref:      (N, node_emb)              node features (rows zero-padded to N)
    w_hops_ref: (n_hops-1, F_max, nh*hid)  per-hop head-fused projections (bf16)
    w_out_ref:  (F_max, hid)               out_att projection (bf16)
    a1_ref:     (L, 1, hid)                attention vec (source part) per layer
    a2_ref:     (L, 1, hid)                attention vec (target part) per layer
    sedge_hbm:  (L, N, N) bf16 in HBM      per-edge scalar + adjacency mask
    o_ref:      (N, out_pad)               lane-dense output (first hid cols valid)
    h_scr:      (N, nh*hid) VMEM           persistent hop hidden state
    sbuf:       (2, N, N) bf16 VMEM        double buffer for sedge slabs
    sem:        DMA semaphores (2,)
    """
    n_pad = x_ref.shape[0]
    L = (n_hops - 1) * n_heads + 1

    copies = {}

    def start_fetch(l):
        cp = pltpu.make_async_copy(sedge_hbm.at[l], sbuf.at[l % 2], sem.at[l % 2])
        cp.start()
        copies[l] = cp

    def attend(h_proj, l, concat):
        # Width-1 "matvecs" as VPU multiply + lane reduce (keeps MXU free).
        s1 = jnp.sum(h_proj * a1_ref[l], axis=-1, keepdims=True)          # (N, 1)
        s2 = jnp.sum(h_proj * a2_ref[l], axis=-1, keepdims=True)          # (N, 1)

        # Attention logits; adjacency mask already folded into the bf16 slab.
        sedge_l = sbuf[l % 2].astype(jnp.float32)                         # (N, N)
        logits = s1 + jnp.transpose(s2) + sedge_l
        lrelu = jnp.where(logits > 0, logits, alpha * logits)

        # Row-max stabilization, clamped at 0: identical math to the reference
        # exp/rowsum (+1e-10 guard rescaled), but cannot overflow to inf/NaN.
        m = jnp.maximum(jnp.max(lrelu, axis=1, keepdims=True), 0.0)       # (N, 1)
        e = jnp.exp(lrelu - m)                                            # off-edge -> 0
        rowsum = jnp.sum(e, axis=1, keepdims=True) + 1e-10 * jnp.exp(-m)
        inv = pl.reciprocal(rowsum, approx=True)                          # EUP slot

        # Aggregation on the MXU (bf16 operands, f32 acc), then residual.
        agg = jnp.dot(e.astype(jnp.bfloat16), h_proj.astype(jnp.bfloat16),
                      preferred_element_type=jnp.float32)                 # (N, hid)
        h_prime = agg * inv + h_proj

        if concat:  # ELU; exp only on the clamped-negative branch (no overflow)
            return jnp.where(h_prime > 0, h_prime,
                             jnp.exp(jnp.minimum(h_prime, 0.0)) - 1.0)
        return h_prime

    start_fetch(0)                                   # prime the double buffer

    l = 0
    for hop in range(n_hops - 1):
        in_f = in_feats[hop]
        h = x_ref[:, :in_f] if hop == 0 else h_scr[...]
        h_bf = h.astype(jnp.bfloat16)                # cast once per hop
        # Head-fused projection: one MXU matmul per hop -> (N, n_heads*hid).
        hp_all = jnp.dot(h_bf, w_hops_ref[hop][:in_f],
                         preferred_element_type=jnp.float32)
        for hd in range(n_heads):
            copies[l].wait()                         # layer l slab resident
            if l + 1 < L:
                start_fetch(l + 1)                   # prefetch next layer's slab
            hp = hp_all[:, hd * hid:(hd + 1) * hid]
            # Write head output into its static column slice of the scratch.
            h_scr[:, hd * hid:(hd + 1) * hid] = attend(hp, l, concat=True)
            l += 1

    # Final (out_att) layer, concat=False.
    in_f_out = h_scr.shape[1]
    h_bf = h_scr[...].astype(jnp.bfloat16)
    hp = jnp.dot(h_bf, w_out_ref[...][:in_f_out],
                 preferred_element_type=jnp.float32)                      # (N, hid)
    copies[l].wait()
    h_final = attend(hp, l, concat=False)

    # Lane-dense store: pad hid columns to a 128-multiple, store unmasked.
    if out_pad > hid:
        h_final = jnp.concatenate(
            [h_final, jnp.zeros((n_pad, out_pad - hid), h_final.dtype)], axis=1)
    o_ref[...] = h_final.astype(o_ref.dtype)


# ----------------------------- model forward -----------------------------

def graph_model_forward(params, nodes, edge_emb, ratings, adj_mask, pairs,
                        edge_rows, edge_cols, *, alpha, n_hops, n_heads,
                        hid_dim, att_dim):
    N = adj_mask.shape[0]
    N_pad = ((N + 7) // 8) * 8
    node_emb = params["emb"].shape[1]
    nh_hid = hid_dim * n_heads
    f_max = max(node_emb, nh_hid)
    out_pad = ((hid_dim + 127) // 128) * 128

    # ---- per-hop head-fused W (heads concatenated along the output dim)
    hop_Ws, in_feats = [], []
    for hop_layers in params["attentions"]:
        W_hop = jnp.concatenate([lp["W"] for lp in hop_layers], axis=1)   # (in_feat, nh*hid)
        in_feats.append(W_hop.shape[0])
        hop_Ws.append(jnp.pad(W_hop, ((0, f_max - W_hop.shape[0]), (0, 0))))
    W_hops = jnp.stack(hop_Ws).astype(jnp.bfloat16)                       # (n_hops-1, F_max, nh*hid)

    W_out_raw = params["out_att"]["W"]                                    # (nh*hid, hid)
    W_out = jnp.pad(W_out_raw,
                    ((0, f_max - W_out_raw.shape[0]), (0, 0))).astype(jnp.bfloat16)

    # ---- all layer attention params in reference order (hop-major, out_att last)
    layers = [lp for hop in params["attentions"] for lp in hop] + [params["out_att"]]
    L = len(layers)

    a1s, a2s, v_res, v_ras = [], [], [], []
    for lp in layers:
        a_flat = lp["a"].reshape(-1)
        a1s.append(a_flat[:hid_dim])
        a2s.append(a_flat[hid_dim:2 * hid_dim])
        a3 = a_flat[2 * hid_dim:2 * hid_dim + att_dim]
        a4 = a_flat[2 * hid_dim + att_dim:]
        v_res.append(lp["re_W"] @ a3)        # (input_size,)
        v_ras.append(lp["ra_W"] @ a4)        # (max_rating,)
    a1_stack = jnp.stack(a1s)[:, None, :]                                 # (L, 1, hid) f32
    a2_stack = jnp.stack(a2s)[:, None, :]                                 # (L, 1, hid) f32

    # ---- single batched gemm + scatter for all layers' per-edge scalars,
    #      adjacency mask folded in (-1e30 off-edge); stored bf16 (halves DMA).
    v_re = jnp.stack(v_res, axis=1)                                       # (input_size, L)
    v_ra = jnp.stack(v_ras, axis=1)                                       # (max_rating, L)
    edge_scalar = edge_emb @ v_re + ratings @ v_ra                        # (E, L)
    s_edge = jnp.full((L, N_pad, N_pad), NEG_INF, jnp.float32)
    s_edge = s_edge.at[:, edge_rows, edge_cols].set(edge_scalar.T)
    s_edge = s_edge.astype(jnp.bfloat16)

    # ---- node features (rows zero-padded to N_pad)
    x = params["emb"][nodes].astype(jnp.float32)                          # (N, node_emb)
    x = jnp.pad(x, ((0, N_pad - N), (0, 0)))

    kernel = functools.partial(
        fused_gat_kernel, alpha=alpha, n_hops=n_hops, n_heads=n_heads,
        hid=hid_dim, in_feats=tuple(in_feats), out_pad=out_pad)

    vmem = pl.BlockSpec(memory_space=pltpu.MemorySpace.VMEM)
    out = pl.pallas_call(
        kernel,
        out_shape=jax.ShapeDtypeStruct((N_pad, out_pad), jnp.float32),
        in_specs=[vmem, vmem, vmem, vmem, vmem,
                  pl.BlockSpec(memory_space=pl.ANY)],        # s_edge stays in HBM
        out_specs=vmem,
        scratch_shapes=[
            pltpu.VMEM((N_pad, nh_hid), jnp.float32),        # persistent hop state
            pltpu.VMEM((2, N_pad, N_pad), jnp.bfloat16),     # s_edge double buffer
            pltpu.SemaphoreType.DMA((2,)),
        ],
    )(x, W_hops, W_out, a1_stack, a2_stack, s_edge)

    out = out[:N, :hid_dim]
    u_feas = out[pairs[:, 0]]
    i_feas = out[pairs[:, 1]]
    return u_feas, i_feas


# ----------------------------- params -----------------------------

def init_graph_model_params(key, *, input_size, node_num, node_emb, hid_dim,
                            n_hops, max_rating, att_dim, n_heads):
    def u(key, shape):
        return jax.random.uniform(key, shape, jnp.float32, minval=-0.1, maxval=0.1)

    keys = iter(jax.random.split(key, 1 + 4 * (n_heads * (n_hops - 1) + 1)))
    params = {"emb": u(next(keys), (node_num, node_emb)), "attentions": [], "out_att": None}

    def make_layer(in_feat):
        return {
            "W": u(next(keys), (in_feat, hid_dim)),
            "a": u(next(keys), (1, 2 * (hid_dim + att_dim))),
            "re_W": u(next(keys), (input_size, att_dim)),
            "ra_W": u(next(keys), (max_rating, att_dim)),
        }

    for i in range(n_hops - 1):
        in_feat = node_emb if i == 0 else hid_dim * n_heads
        params["attentions"].append([make_layer(in_feat) for _ in range(n_heads)])
    params["out_att"] = make_layer(hid_dim * n_heads)
    return params


# ----------------------------- main -----------------------------

if __name__ == "__main__":
    # small hyperparameters
    input_size = 8      # edge (review) embedding size
    node_num   = 20
    node_emb   = 16
    hid_dim    = 16
    n_hops     = 3
    max_rating = 5
    att_dim    = 8
    n_heads    = 2
    alpha      = 0.2
    keep_prob  = 1.0    # dropout disabled (eval)

    N = 16              # number of nodes in this graph

    # deterministic adjacency (host-side, defines static edge list like adj.nonzero())
    rng = np.random.RandomState(0)
    adj_np = (rng.rand(N, N) < 0.3).astype(np.float32)
    np.fill_diagonal(adj_np, 1.0)
    rows_np, cols_np = np.nonzero(adj_np)       # row-major, same order as torch.nonzero
    E = rows_np.shape[0]

    key = jax.random.PRNGKey(0)
    k_par, k_rev, k_rat = jax.random.split(key, 3)

    params = init_graph_model_params(
        k_par, input_size=input_size, node_num=node_num, node_emb=node_emb,
        hid_dim=hid_dim, n_hops=n_hops, max_rating=max_rating,
        att_dim=att_dim, n_heads=n_heads)

    nodes = jnp.arange(N, dtype=jnp.int32) % node_num
    edge_emb = jax.random.normal(k_rev, (E, input_size), jnp.float32)      # per-edge review emb
    rating_ids = jax.random.randint(k_rat, (E,), 0, max_rating)
    ratings = jax.nn.one_hot(rating_ids, max_rating, dtype=jnp.float32)    # (E, max_rating)
    pairs = jnp.array([[0, 1], [2, 3], [4, 5], [6, 7]], dtype=jnp.int32)

    adj_mask = jnp.asarray(adj_np, jnp.float32)
    edge_rows = jnp.asarray(rows_np, jnp.int32)
    edge_cols = jnp.asarray(cols_np, jnp.int32)

    fwd = jax.jit(functools.partial(
        graph_model_forward, alpha=alpha, n_hops=n_hops, n_heads=n_heads,
        hid_dim=hid_dim, att_dim=att_dim))

    u_feas, i_feas = fwd(params, nodes, edge_emb, ratings, adj_mask, pairs,
                         edge_rows, edge_cols)

    jax.block_until_ready((u_feas, i_feas))
    assert u_feas.shape == (pairs.shape[0], hid_dim)
    assert i_feas.shape == (pairs.shape[0], hid_dim)
    assert bool(jnp.all(jnp.isfinite(u_feas))) and bool(jnp.all(jnp.isfinite(i_feas)))
    print("KERNEL_OK")
</pallas_src>

<mosaic_0001>
module attributes {stable_mosaic.version = 11 : i64} {
  func.func @fused_gat_kernel(%arg0: memref<16x16xf32, #tpu.memory_space<vmem>>, %arg1: memref<2x32x32xbf16, #tpu.memory_space<vmem>>, %arg2: memref<32x16xbf16, #tpu.memory_space<vmem>>, %arg3: memref<5x1x16xf32, #tpu.memory_space<vmem>>, %arg4: memref<5x1x16xf32, #tpu.memory_space<vmem>>, %arg5: memref<5x16x16xbf16, #tpu.memory_space<any>>, %arg6: memref<16x128xf32, #tpu.memory_space<vmem>>, %arg7: memref<16x32xf32, #tpu.memory_space<vmem>>, %arg8: memref<2x16x16xbf16, #tpu.memory_space<vmem>>, %arg9: memref<2x!tpu.dma_semaphore, #tpu.memory_space<semaphore_mem>>) attributes {dimension_semantics = [], scalar_prefetch = 0 : i64, scratch_operands = 3 : i64, tpu.core_type = #tpu.core_type<tc>} {
    %c0_i32 = arith.constant 0 : i32
    %c0_i32_0 = arith.constant 0 : i32
    %c0_i32_1 = arith.constant 0 : i32
    %c0_i32_2 = arith.constant 0 : i32
    %c0_i32_3 = arith.constant 0 : i32
    %0 = tpu.memref_slice %arg5[%c0_i32, %c0_i32_2, %c0_i32_3] : memref<5x16x16xbf16, #tpu.memory_space<any>> -> memref<1x16x16xbf16, #tpu.memory_space<any>>
    %1 = tpu.memref_squeeze %0 : memref<1x16x16xbf16, #tpu.memory_space<any>> -> memref<16x16xbf16, #tpu.memory_space<any>>
    %c0_i32_4 = arith.constant 0 : i32
    %c0_i32_5 = arith.constant 0 : i32
    %2 = tpu.memref_slice %arg8[%c0_i32_0, %c0_i32_4, %c0_i32_5] : memref<2x16x16xbf16, #tpu.memory_space<vmem>> -> memref<1x16x16xbf16, #tpu.memory_space<vmem>>
    %3 = tpu.memref_squeeze %2 : memref<1x16x16xbf16, #tpu.memory_space<vmem>> -> memref<16x16xbf16, #tpu.memory_space<vmem>>
    %4 = tpu.memref_slice %arg9[%c0_i32_1] : memref<2x!tpu.dma_semaphore, #tpu.memory_space<semaphore_mem>> -> memref<1x!tpu.dma_semaphore, #tpu.memory_space<semaphore_mem>>
    %5 = tpu.memref_squeeze %4 : memref<1x!tpu.dma_semaphore, #tpu.memory_space<semaphore_mem>> -> memref<!tpu.dma_semaphore, #tpu.memory_space<semaphore_mem>>
    tpu.enqueue_dma source(%1 : memref<16x16xbf16, #tpu.memory_space<any>>) target(%3 : memref<16x16xbf16, #tpu.memory_space<vmem>>) target_semaphore(%5 : memref<!tpu.dma_semaphore, #tpu.memory_space<semaphore_mem>>)
    %c0 = arith.constant 0 : index
    %c0_6 = arith.constant 0 : index
    %6 = vector.load %arg0[%c0, %c0_6] : memref<16x16xf32, #tpu.memory_space<vmem>>, vector<16x16xf32>
    %7 = arith.truncf %6 : vector<16x16xf32> to vector<16x16xbf16>
    %c0_7 = arith.constant 0 : index
    %c0_8 = arith.constant 0 : index
    %c0_9 = arith.constant 0 : index
    %8 = vector.load %arg1[%c0_7, %c0_8, %c0_9] : memref<2x32x32xbf16, #tpu.memory_space<vmem>>, vector<1x32x32xbf16>
    %9 = vector.shape_cast %8 : vector<1x32x32xbf16> to vector<32x32xbf16>
    %10 = vector.extract_strided_slice %9 {offsets = [0, 0], sizes = [16, 32], strides = [1, 1]} : vector<32x32xbf16> to vector<16x32xbf16>
    %cst = arith.constant dense<0.000000e+00> : vector<16x32xf32>
    %11 = tpu.matmul %7, %10, %cst {dimension_numbers = #tpu.dot_dimension_numbers<[1], [0], [0], [1], [0, 0, 1, 1], [], []>} : vector<16x16xbf16>, vector<16x32xbf16>, vector<16x32xf32> -> vector<16x32xf32>
    %c0_i32_10 = arith.constant 0 : i32
    %c0_i32_11 = arith.constant 0 : i32
    %c0_i32_12 = arith.constant 0 : i32
    %c0_i32_13 = arith.constant 0 : i32
    %c0_i32_14 = arith.constant 0 : i32
    %12 = tpu.memref_slice %arg5[%c0_i32_10, %c0_i32_13, %c0_i32_14] : memref<5x16x16xbf16, #tpu.memory_space<any>> -> memref<1x16x16xbf16, #tpu.memory_space<any>>
    %13 = tpu.memref_squeeze %12 : memref<1x16x16xbf16, #tpu.memory_space<any>> -> memref<16x16xbf16, #tpu.memory_space<any>>
    %c0_i32_15 = arith.constant 0 : i32
    %c0_i32_16 = arith.constant 0 : i32
    %14 = tpu.memref_slice %arg8[%c0_i32_11, %c0_i32_15, %c0_i32_16] : memref<2x16x16xbf16, #tpu.memory_space<vmem>> -> memref<1x16x16xbf16, #tpu.memory_space<vmem>>
    %15 = tpu.memref_squeeze %14 : memref<1x16x16xbf16, #tpu.memory_space<vmem>> -> memref<16x16xbf16, #tpu.memory_space<vmem>>
    %16 = tpu.memref_slice %arg9[%c0_i32_12] : memref<2x!tpu.dma_semaphore, #tpu.memory_space<semaphore_mem>> -> memref<1x!tpu.dma_semaphore, #tpu.memory_space<semaphore_mem>>
    %17 = tpu.memref_squeeze %16 : memref<1x!tpu.dma_semaphore, #tpu.memory_space<semaphore_mem>> -> memref<!tpu.dma_semaphore, #tpu.memory_space<semaphore_mem>>
    tpu.wait_dma2 semaphore(%17 : memref<!tpu.dma_semaphore, #tpu.memory_space<semaphore_mem>>) src(%13 : memref<16x16xbf16, #tpu.memory_space<any>>) dst(%15 : memref<16x16xbf16, #tpu.memory_space<vmem>>)
    %c1_i32 = arith.constant 1 : i32
    %c1_i32_17 = arith.constant 1 : i32
    %c1_i32_18 = arith.constant 1 : i32
    %c0_i32_19 = arith.constant 0 : i32
    %c0_i32_20 = arith.constant 0 : i32
    %18 = tpu.memref_slice %arg5[%c1_i32, %c0_i32_19, %c0_i32_20] : memref<5x16x16xbf16, #tpu.memory_space<any>> -> memref<1x16x16xbf16, #tpu.memory_space<any>>
    %19 = tpu.memref_squeeze %18 : memref<1x16x16xbf16, #tpu.memory_space<any>> -> memref<16x16xbf16, #tpu.memory_space<any>>
    %c0_i32_21 = arith.constant 0 : i32
    %c0_i32_22 = arith.constant 0 : i32
    %20 = tpu.memref_slice %arg8[%c1_i32_17, %c0_i32_21, %c0_i32_22] : memref<2x16x16xbf16, #tpu.memory_space<vmem>> -> memref<1x16x16xbf16, #tpu.memory_space<vmem>>
    %21 = tpu.memref_squeeze %20 : memref<1x16x16xbf16, #tpu.memory_space<vmem>> -> memref<16x16xbf16, #tpu.memory_space<vmem>>
    %22 = tpu.memref_slice %arg9[%c1_i32_18] : memref<2x!tpu.dma_semaphore, #tpu.memory_space<semaphore_mem>> -> memref<1x!tpu.dma_semaphore, #tpu.memory_space<semaphore_mem>>
    %23 = tpu.memref_squeeze %22 : memref<1x!tpu.dma_semaphore, #tpu.memory_space<semaphore_mem>> -> memref<!tpu.dma_semaphore, #tpu.memory_space<semaphore_mem>>
    tpu.enqueue_dma source(%19 : memref<16x16xbf16, #tpu.memory_space<any>>) target(%21 : memref<16x16xbf16, #tpu.memory_space<vmem>>) target_semaphore(%23 : memref<!tpu.dma_semaphore, #tpu.memory_space<semaphore_mem>>)
    %24 = vector.extract_strided_slice %11 {offsets = [0, 0], sizes = [16, 16], strides = [1, 1]} : vector<16x32xf32> to vector<16x16xf32>
    %c0_23 = arith.constant 0 : index
    %c0_24 = arith.constant 0 : index
    %c0_25 = arith.constant 0 : index
    %25 = vector.load %arg3[%c0_23, %c0_24, %c0_25] : memref<5x1x16xf32, #tpu.memory_space<vmem>>, vector<1x1x16xf32>
    %26 = vector.shape_cast %25 : vector<1x1x16xf32> to vector<1x16xf32>
    %27 = vector.broadcast %26 : vector<1x16xf32> to vector<16x16xf32>
    %28 = arith.mulf %24, %27 : vector<16x16xf32>
    %cst_26 = arith.constant dense<0.000000e+00> : vector<16xf32>
    %29 = vector.multi_reduction <add>, %28, %cst_26 [1] : vector<16x16xf32> to vector<16xf32>
    %30 = vector.shape_cast %29 : vector<16xf32> to vector<16x1xf32>
    %c0_27 = arith.constant 0 : index
    %c0_28 = arith.constant 0 : index
    %c0_29 = arith.constant 0 : index
    %31 = vector.load %arg4[%c0_27, %c0_28, %c0_29] : memref<5x1x16xf32, #tpu.memory_space<vmem>>, vector<1x1x16xf32>
    %32 = vector.shape_cast %31 : vector<1x1x16xf32> to vector<1x16xf32>
    %33 = vector.broadcast %32 : vector<1x16xf32> to vector<16x16xf32>
    %34 = arith.mulf %24, %33 : vector<16x16xf32>
    %cst_30 = arith.constant dense<0.000000e+00> : vector<16xf32>
    %35 = vector.multi_reduction <add>, %34, %cst_30 [1] : vector<16x16xf32> to vector<16xf32>
    %36 = vector.shape_cast %35 : vector<16xf32> to vector<16x1xf32>
    %c0_31 = arith.constant 0 : index
    %c0_32 = arith.constant 0 : index
    %c0_33 = arith.constant 0 : index
    %37 = vector.load %arg8[%c0_31, %c0_32, %c0_33] : memref<2x16x16xbf16, #tpu.memory_space<vmem>>, vector<1x16x16xbf16>
    %38 = vector.shape_cast %37 : vector<1x16x16xbf16> to vector<16x16xbf16>
    %39 = arith.extf %38 : vector<16x16xbf16> to vector<16x16xf32>
    %40 = tpu.transpose %36, [1, 0] : vector<16x1xf32> -> vector<1x16xf32>
    %41 = vector.broadcast %30 : vector<16x1xf32> to vector<16x16xf32>
    %42 = vector.broadcast %40 : vector<1x16xf32> to vector<16x16xf32>
    %43 = arith.addf %41, %42 : vector<16x16xf32>
    %44 = arith.addf %43, %39 : vector<16x16xf32>
    %cst_34 = arith.constant 0.000000e+00 : f32
    %45 = vector.broadcast %cst_34 : f32 to vector<16x16xf32>
    %46 = arith.cmpf ogt, %44, %45 : vector<16x16xf32>
    %cst_35 = arith.constant 2.000000e-01 : f32
    %47 = vector.broadcast %cst_35 : f32 to vector<16x16xf32>
    %48 = arith.mulf %47, %44 : vector<16x16xf32>
    %49 = arith.select %46, %44, %48 : vector<16x16xi1>, vector<16x16xf32>
    %cst_36 = arith.constant dense<0xFF800000> : vector<16xf32>
    %50 = vector.multi_reduction <maximumf>, %49, %cst_36 [1] : vector<16x16xf32> to vector<16xf32>
    %51 = vector.shape_cast %50 : vector<16xf32> to vector<16x1xf32>
    %cst_37 = arith.constant 0.000000e+00 : f32
    %52 = vector.broadcast %cst_37 : f32 to vector<16x1xf32>
    %53 = arith.maximumf %51, %52 : vector<16x1xf32>
    %54 = vector.broadcast %53 : vector<16x1xf32> to vector<16x16xf32>
    %55 = arith.subf %49, %54 : vector<16x16xf32>
    %56 = math.exp %55 : vector<16x16xf32>
    %cst_38 = arith.constant dense<0.000000e+00> : vector<16xf32>
    %57 = vector.multi_reduction <add>, %56, %cst_38 [1] : vector<16x16xf32> to vector<16xf32>
    %58 = vector.shape_cast %57 : vector<16xf32> to vector<16x1xf32>
    %cst_39 = arith.constant 0.000000e+00 : f32
    %59 = vector.broadcast %cst_39 : f32 to vector<16x1xf32>
    %60 = arith.subf %59, %53 : vector<16x1xf32>
    %61 = math.exp %60 : vector<16x1xf32>
    %cst_40 = arith.constant 1.000000e-10 : f32
    %62 = vector.broadcast %cst_40 : f32 to vector<16x1xf32>
    %63 = arith.mulf %62, %61 : vector<16x1xf32>
    %64 = arith.addf %58, %63 : vector<16x1xf32>
    %65 = tpu.reciprocal %64 {approx = true} : vector<16x1xf32> -> vector<16x1xf32>
    %66 = arith.truncf %56 : vector<16x16xf32> to vector<16x16xbf16>
    %67 = arith.truncf %24 : vector<16x16xf32> to vector<16x16xbf16>
    %cst_41 = arith.constant dense<0.000000e+00> : vector<16x16xf32>
    %68 = tpu.matmul %66, %67, %cst_41 {dimension_numbers = #tpu.dot_dimension_numbers<[1], [0], [0], [1], [0, 0, 1, 1], [], []>} : vector<16x16xbf16>, vector<16x16xbf16>, vector<16x16xf32> -> vector<16x16xf32>
    %69 = vector.broadcast %65 : vector<16x1xf32> to vector<16x16xf32>
    %70 = arith.mulf %68, %69 : vector<16x16xf32>
    %71 = arith.addf %70, %24 : vector<16x16xf32>
    %cst_42 = arith.constant 0.000000e+00 : f32
    %72 = vector.broadcast %cst_42 : f32 to vector<16x16xf32>
    %73 = arith.cmpf ogt, %71, %72 : vector<16x16xf32>
    %cst_43 = arith.constant 0.000000e+00 : f32
    %74 = vector.broadcast %cst_43 : f32 to vector<16x16xf32>
    %75 = arith.minimumf %71, %74 : vector<16x16xf32>
    %76 = math.exp %75 : vector<16x16xf32>
    %cst_44 = arith.constant 1.000000e+00 : f32
    %77 = vector.broadcast %cst_44 : f32 to vector<16x16xf32>
    %78 = arith.subf %76, %77 : vector<16x16xf32>
    %79 = arith.select %73, %71, %78 : vector<16x16xi1>, vector<16x16xf32>
    %c0_45 = arith.constant 0 : index
    %c0_46 = arith.constant 0 : index
    %80 = vector.load %arg7[%c0_45, %c0_46] : memref<16x32xf32, #tpu.memory_space<vmem>>, vector<16x16xf32>
    tpu.vector_store %arg7[%c0_45, %c0_46], %79 {strides = array<i32>} : memref<16x32xf32, #tpu.memory_space<vmem>>, vector<16x16xf32>,
    %c1_i32_47 = arith.constant 1 : i32
    %c1_i32_48 = arith.constant 1 : i32
    %c1_i32_49 = arith.constant 1 : i32
    %c0_i32_50 = arith.constant 0 : i32
    %c0_i32_51 = arith.constant 0 : i32
    %81 = tpu.memref_slice %arg5[%c1_i32_47, %c0_i32_50, %c0_i32_51] : memref<5x16x16xbf16, #tpu.memory_space<any>> -> memref<1x16x16xbf16, #tpu.memory_space<any>>
    %82 = tpu.memref_squeeze %81 : memref<1x16x16xbf16, #tpu.memory_space<any>> -> memref<16x16xbf16, #tpu.memory_space<any>>
    %c0_i32_52 = arith.constant 0 : i32
    %c0_i32_53 = arith.constant 0 : i32
    %83 = tpu.memref_slice %arg8[%c1_i32_48, %c0_i32_52, %c0_i32_53] : memref<2x16x16xbf16, #tpu.memory_space<vmem>> -> memref<1x16x16xbf16, #tpu.memory_space<vmem>>
    %84 = tpu.memref_squeeze %83 : memref<1x16x16xbf16, #tpu.memory_space<vmem>> -> memref<16x16xbf16, #tpu.memory_space<vmem>>
    %85 = tpu.memref_slice %arg9[%c1_i32_49] : memref<2x!tpu.dma_semaphore, #tpu.memory_space<semaphore_mem>> -> memref<1x!tpu.dma_semaphore, #tpu.memory_space<semaphore_mem>>
    %86 = tpu.memref_squeeze %85 : memref<1x!tpu.dma_semaphore, #tpu.memory_space<semaphore_mem>> -> memref<!tpu.dma_semaphore, #tpu.memory_space<semaphore_mem>>
    tpu.wait_dma2 semaphore(%86 : memref<!tpu.dma_semaphore, #tpu.memory_space<semaphore_mem>>) src(%82 : memref<16x16xbf16, #tpu.memory_space<any>>) dst(%84 : memref<16x16xbf16, #tpu.memory_space<vmem>>)
    %c2_i32 = arith.constant 2 : i32
    %c0_i32_54 = arith.constant 0 : i32
    %c0_i32_55 = arith.constant 0 : i32
    %c0_i32_56 = arith.constant 0 : i32
    %c0_i32_57 = arith.constant 0 : i32
    %87 = tpu.memref_slice %arg5[%c2_i32, %c0_i32_56, %c0_i32_57] : memref<5x16x16xbf16, #tpu.memory_space<any>> -> memref<1x16x16xbf16, #tpu.memory_space<any>>
    %88 = tpu.memref_squeeze %87 : memref<1x16x16xbf16, #tpu.memory_space<any>> -> memref<16x16xbf16, #tpu.memory_space<any>>
    %c0_i32_58 = arith.constant 0 : i32
    %c0_i32_59 = arith.constant 0 : i32
    %89 = tpu.memref_slice %arg8[%c0_i32_54, %c0_i32_58, %c0_i32_59] : memref<2x16x16xbf16, #tpu.memory_space<vmem>> -> memref<1x16x16xbf16, #tpu.memory_space<vmem>>
    %90 = tpu.memref_squeeze %89 : memref<1x16x16xbf16, #tpu.memory_space<vmem>> -> memref<16x16xbf16, #tpu.memory_space<vmem>>
    %91 = tpu.memref_slice %arg9[%c0_i32_55] : memref<2x!tpu.dma_semaphore, #tpu.memory_space<semaphore_mem>> -> memref<1x!tpu.dma_semaphore, #tpu.memory_space<semaphore_mem>>
    %92 = tpu.memref_squeeze %91 : memref<1x!tpu.dma_semaphore, #tpu.memory_space<semaphore_mem>> -> memref<!tpu.dma_semaphore, #tpu.memory_space<semaphore_mem>>
    tpu.enqueue_dma source(%88 : memref<16x16xbf16, #tpu.memory_space<any>>) target(%90 : memref<16x16xbf16, #tpu.memory_space<vmem>>) target_semaphore(%92 : memref<!tpu.dma_semaphore, #tpu.memory_space<semaphore_mem>>)
    %93 = vector.extract_strided_slice %11 {offsets = [0, 16], sizes = [16, 16], strides = [1, 1]} : vector<16x32xf32> to vector<16x16xf32>
    %c1 = arith.constant 1 : index
    %c0_60 = arith.constant 0 : index
    %c0_61 = arith.constant 0 : index
    %94 = vector.load %arg3[%c1, %c0_60, %c0_61] : memref<5x1x16xf32, #tpu.memory_space<vmem>>, vector<1x1x16xf32>
    %95 = vector.shape_cast %94 : vector<1x1x16xf32> to vector<1x16xf32>
    %96 = vector.broadcast %95 : vector<1x16xf32> to vector<16x16xf32>
    %97 = arith.mulf %93, %96 : vector<16x16xf32>
    %cst_62 = arith.constant dense<0.000000e+00> : vector<16xf32>
    %98 = vector.multi_reduction <add>, %97, %cst_62 [1] : vector<16x16xf32> to vector<16xf32>
    %99 = vector.shape_cast %98 : vector<16xf32> to vector<16x1xf32>
    %c1_63 = arith.constant 1 : index
    %c0_64 = arith.constant 0 : index
    %c0_65 = arith.constant 0 : index
    %100 = vector.load %arg4[%c1_63, %c0_64, %c0_65] : memref<5x1x16xf32, #tpu.memory_space<vmem>>, vector<1x1x16xf32>
    %101 = vector.shape_cast %100 : vector<1x1x16xf32> to vector<1x16xf32>
    %102 = vector.broadcast %101 : vector<1x16xf32> to vector<16x16xf32>
    %103 = arith.mulf %93, %102 : vector<16x16xf32>
    %cst_66 = arith.constant dense<0.000000e+00> : vector<16xf32>
    %104 = vector.multi_reduction <add>, %103, %cst_66 [1] : vector<16x16xf32> to vector<16xf32>
    %105 = vector.shape_cast %104 : vector<16xf32> to vector<16x1xf32>
    %c1_67 = arith.constant 1 : index
    %c0_68 = arith.constant 0 : index
    %c0_69 = arith.constant 0 : index
    %106 = vector.load %arg8[%c1_67, %c0_68, %c0_69] : memref<2x16x16xbf16, #tpu.memory_space<vmem>>, vector<1x16x16xbf16>
    %107 = vector.shape_cast %106 : vector<1x16x16xbf16> to vector<16x16xbf16>
    %108 = arith.extf %107 : vector<16x16xbf16> to vector<16x16xf32>
    %109 = tpu.transpose %105, [1, 0] : vector<16x1xf32> -> vector<1x16xf32>
    %110 = vector.broadcast %99 : vector<16x1xf32> to vector<16x16xf32>
    %111 = vector.broadcast %109 : vector<1x16xf32> to vector<16x16xf32>
    %112 = arith.addf %110, %111 : vector<16x16xf32>
    %113 = arith.addf %112, %108 : vector<16x16xf32>
    %cst_70 = arith.constant 0.000000e+00 : f32
    %114 = vector.broadcast %cst_70 : f32 to vector<16x16xf32>
    %115 = arith.cmpf ogt, %113, %114 : vector<16x16xf32>
    %cst_71 = arith.constant 2.000000e-01 : f32
    %116 = vector.broadcast %cst_71 : f32 to vector<16x16xf32>
    %117 = arith.mulf %116, %113 : vector<16x16xf32>
    %118 = arith.select %115, %113, %117 : vector<16x16xi1>, vector<16x16xf32>
    %cst_72 = arith.constant dense<0xFF800000> : vector<16xf32>
    %119 = vector.multi_reduction <maximumf>, %118, %cst_72 [1] : vector<16x16xf32> to vector<16xf32>
    %120 = vector.shape_cast %119 : vector<16xf32> to vector<16x1xf32>
    %cst_73 = arith.constant 0.000000e+00 : f32
    %121 = vector.broadcast %cst_73 : f32 to vector<16x1xf32>
    %122 = arith.maximumf %120, %121 : vector<16x1xf32>
    %123 = vector.broadcast %122 : vector<16x1xf32> to vector<16x16xf32>
    %124 = arith.subf %118, %123 : vector<16x16xf32>
    %125 = math.exp %124 : vector<16x16xf32>
    %cst_74 = arith.constant dense<0.000000e+00> : vector<16xf32>
    %126 = vector.multi_reduction <add>, %125, %cst_74 [1] : vector<16x16xf32> to vector<16xf32>
    %127 = vector.shape_cast %126 : vector<16xf32> to vector<16x1xf32>
    %cst_75 = arith.constant 0.000000e+00 : f32
    %128 = vector.broadcast %cst_75 : f32 to vector<16x1xf32>
    %129 = arith.subf %128, %122 : vector<16x1xf32>
    %130 = math.exp %129 : vector<16x1xf32>
    %cst_76 = arith.constant 1.000000e-10 : f32
    %131 = vector.broadcast %cst_76 : f32 to vector<16x1xf32>
    %132 = arith.mulf %131, %130 : vector<16x1xf32>
    %133 = arith.addf %127, %132 : vector<16x1xf32>
    %134 = tpu.reciprocal %133 {approx = true} : vector<16x1xf32> -> vector<16x1xf32>
    %135 = arith.truncf %125 : vector<16x16xf32> to vector<16x16xbf16>
    %136 = arith.truncf %93 : vector<16x16xf32> to vector<16x16xbf16>
    %cst_77 = arith.constant dense<0.000000e+00> : vector<16x16xf32>
    %137 = tpu.matmul %135, %136, %cst_77 {dimension_numbers = #tpu.dot_dimension_numbers<[1], [0], [0], [1], [0, 0, 1, 1], [], []>} : vector<16x16xbf16>, vector<16x16xbf16>, vector<16x16xf32> -> vector<16x16xf32>
    %138 = vector.broadcast %134 : vector<16x1xf32> to vector<16x16xf32>
    %139 = arith.mulf %137, %138 : vector<16x16xf32>
    %140 = arith.addf %139, %93 : vector<16x16xf32>
    %cst_78 = arith.constant 0.000000e+00 : f32
    %141 = vector.broadcast %cst_78 : f32 to vector<16x16xf32>
    %142 = arith.cmpf ogt, %140, %141 : vector<16x16xf32>
    %cst_79 = arith.constant 0.000000e+00 : f32
    %143 = vector.broadcast %cst_79 : f32 to vector<16x16xf32>
    %144 = arith.minimumf %140, %143 : vector<16x16xf32>
    %145 = math.exp %144 : vector<16x16xf32>
    %cst_80 = arith.constant 1.000000e+00 : f32
    %146 = vector.broadcast %cst_80 : f32 to vector<16x16xf32>
    %147 = arith.subf %145, %146 : vector<16x16xf32>
    %148 = arith.select %142, %140, %147 : vector<16x16xi1>, vector<16x16xf32>
    %c0_81 = arith.constant 0 : index
    %c16 = arith.constant 16 : index
    %149 = vector.load %arg7[%c0_81, %c16] : memref<16x32xf32, #tpu.memory_space<vmem>>, vector<16x16xf32>
    tpu.vector_store %arg7[%c0_81, %c16], %148 {strides = array<i32>} : memref<16x32xf32, #tpu.memory_space<vmem>>, vector<16x16xf32>,
    %c0_82 = arith.constant 0 : index
    %c0_83 = arith.constant 0 : index
    %150 = vector.load %arg7[%c0_82, %c0_83] : memref<16x32xf32, #tpu.memory_space<vmem>>, vector<16x32xf32>
    %151 = arith.truncf %150 : vector<16x32xf32> to vector<16x32xbf16>
    %c1_84 = arith.constant 1 : index
    %c0_85 = arith.constant 0 : index
    %c0_86 = arith.constant 0 : index
    %152 = vector.load %arg1[%c1_84, %c0_85, %c0_86] : memref<2x32x32xbf16, #tpu.memory_space<vmem>>, vector<1x32x32xbf16>
    %153 = vector.shape_cast %152 : vector<1x32x32xbf16> to vector<32x32xbf16>
    %cst_87 = arith.constant dense<0.000000e+00> : vector<16x32xf32>
    %154 = tpu.matmul %151, %153, %cst_87 {dimension_numbers = #tpu.dot_dimension_numbers<[1], [0], [0], [1], [0, 0, 1, 1], [], []>} : vector<16x32xbf16>, vector<32x32xbf16>, vector<16x32xf32> -> vector<16x32xf32>
    %c2_i32_88 = arith.constant 2 : i32
    %c0_i32_89 = arith.constant 0 : i32
    %c0_i32_90 = arith.constant 0 : i32
    %c0_i32_91 = arith.constant 0 : i32
    %c0_i32_92 = arith.constant 0 : i32
    %155 = tpu.memref_slice %arg5[%c2_i32_88, %c0_i32_91, %c0_i32_92] : memref<5x16x16xbf16, #tpu.memory_space<any>> -> memref<1x16x16xbf16, #tpu.memory_space<any>>
    %156 = tpu.memref_squeeze %155 : memref<1x16x16xbf16, #tpu.memory_space<any>> -> memref<16x16xbf16, #tpu.memory_space<any>>
    %c0_i32_93 = arith.constant 0 : i32
    %c0_i32_94 = arith.constant 0 : i32
    %157 = tpu.memref_slice %arg8[%c0_i32_89, %c0_i32_93, %c0_i32_94] : memref<2x16x16xbf16, #tpu.memory_space<vmem>> -> memref<1x16x16xbf16, #tpu.memory_space<vmem>>
    %158 = tpu.memref_squeeze %157 : memref<1x16x16xbf16, #tpu.memory_space<vmem>> -> memref<16x16xbf16, #tpu.memory_space<vmem>>
    %159 = tpu.memref_slice %arg9[%c0_i32_90] : memref<2x!tpu.dma_semaphore, #tpu.memory_space<semaphore_mem>> -> memref<1x!tpu.dma_semaphore, #tpu.memory_space<semaphore_mem>>
    %160 = tpu.memref_squeeze %159 : memref<1x!tpu.dma_semaphore, #tpu.memory_space<semaphore_mem>> -> memref<!tpu.dma_semaphore, #tpu.memory_space<semaphore_mem>>
    tpu.wait_dma2 semaphore(%160 : memref<!tpu.dma_semaphore, #tpu.memory_space<semaphore_mem>>) src(%156 : memref<16x16xbf16, #tpu.memory_space<any>>) dst(%158 : memref<16x16xbf16, #tpu.memory_space<vmem>>)
    %c3_i32 = arith.constant 3 : i32
    %c1_i32_95 = arith.constant 1 : i32
    %c1_i32_96 = arith.constant 1 : i32
    %c0_i32_97 = arith.constant 0 : i32
    %c0_i32_98 = arith.constant 0 : i32
    %161 = tpu.memref_slice %arg5[%c3_i32, %c0_i32_97, %c0_i32_98] : memref<5x16x16xbf16, #tpu.memory_space<any>> -> memref<1x16x16xbf16, #tpu.memory_space<any>>
    %162 = tpu.memref_squeeze %161 : memref<1x16x16xbf16, #tpu.memory_space<any>> -> memref<16x16xbf16, #tpu.memory_space<any>>
    %c0_i32_99 = arith.constant 0 : i32
    %c0_i32_100 = arith.constant 0 : i32
    %163 = tpu.memref_slice %arg8[%c1_i32_95, %c0_i32_99, %c0_i32_100] : memref<2x16x16xbf16, #tpu.memory_space<vmem>> -> memref<1x16x16xbf16, #tpu.memory_space<vmem>>
    %164 = tpu.memref_squeeze %163 : memref<1x16x16xbf16, #tpu.memory_space<vmem>> -> memref<16x16xbf16, #tpu.memory_space<vmem>>
    %165 = tpu.memref_slice %arg9[%c1_i32_96] : memref<2x!tpu.dma_semaphore, #tpu.memory_space<semaphore_mem>> -> memref<1x!tpu.dma_semaphore, #tpu.memory_space<semaphore_mem>>
    %166 = tpu.memref_squeeze %165 : memref<1x!tpu.dma_semaphore, #tpu.memory_space<semaphore_mem>> -> memref<!tpu.dma_semaphore, #tpu.memory_space<semaphore_mem>>
    tpu.enqueue_dma source(%162 : memref<16x16xbf16, #tpu.memory_space<any>>) target(%164 : memref<16x16xbf16, #tpu.memory_space<vmem>>) target_semaphore(%166 : memref<!tpu.dma_semaphore, #tpu.memory_space<semaphore_mem>>)
    %167 = vector.extract_strided_slice %154 {offsets = [0, 0], sizes = [16, 16], strides = [1, 1]} : vector<16x32xf32> to vector<16x16xf32>
    %c2 = arith.constant 2 : index
    %c0_101 = arith.constant 0 : index
    %c0_102 = arith.constant 0 : index
    %168 = vector.load %arg3[%c2, %c0_101, %c0_102] : memref<5x1x16xf32, #tpu.memory_space<vmem>>, vector<1x1x16xf32>
    %169 = vector.shape_cast %168 : vector<1x1x16xf32> to vector<1x16xf32>
    %170 = vector.broadcast %169 : vector<1x16xf32> to vector<16x16xf32>
    %171 = arith.mulf %167, %170 : vector<16x16xf32>
    %cst_103 = arith.constant dense<0.000000e+00> : vector<16xf32>
    %172 = vector.multi_reduction <add>, %171, %cst_103 [1] : vector<16x16xf32> to vector<16xf32>
    %173 = vector.shape_cast %172 : vector<16xf32> to vector<16x1xf32>
    %c2_104 = arith.constant 2 : index
    %c0_105 = arith.constant 0 : index
    %c0_106 = arith.constant 0 : index
    %174 = vector.load %arg4[%c2_104, %c0_105, %c0_106] : memref<5x1x16xf32, #tpu.memory_space<vmem>>, vector<1x1x16xf32>
    %175 = vector.shape_cast %174 : vector<1x1x16xf32> to vector<1x16xf32>
    %176 = vector.broadcast %175 : vector<1x16xf32> to vector<16x16xf32>
    %177 = arith.mulf %167, %176 : vector<16x16xf32>
    %cst_107 = arith.constant dense<0.000000e+00> : vector<16xf32>
    %178 = vector.multi_reduction <add>, %177, %cst_107 [1] : vector<16x16xf32> to vector<16xf32>
    %179 = vector.shape_cast %178 : vector<16xf32> to vector<16x1xf32>
    %c0_108 = arith.constant 0 : index
    %c0_109 = arith.constant 0 : index
    %c0_110 = arith.constant 0 : index
    %180 = vector.load %arg8[%c0_108, %c0_109, %c0_110] : memref<2x16x16xbf16, #tpu.memory_space<vmem>>, vector<1x16x16xbf16>
    %181 = vector.shape_cast %180 : vector<1x16x16xbf16> to vector<16x16xbf16>
    %182 = arith.extf %181 : vector<16x16xbf16> to vector<16x16xf32>
    %183 = tpu.transpose %179, [1, 0] : vector<16x1xf32> -> vector<1x16xf32>
    %184 = vector.broadcast %173 : vector<16x1xf32> to vector<16x16xf32>
    %185 = vector.broadcast %183 : vector<1x16xf32> to vector<16x16xf32>
    %186 = arith.addf %184, %185 : vector<16x16xf32>
    %187 = arith.addf %186, %182 : vector<16x16xf32>
    %cst_111 = arith.constant 0.000000e+00 : f32
    %188 = vector.broadcast %cst_111 : f32 to vector<16x16xf32>
    %189 = arith.cmpf ogt, %187, %188 : vector<16x16xf32>
    %cst_112 = arith.constant 2.000000e-01 : f32
    %190 = vector.broadcast %cst_112 : f32 to vector<16x16xf32>
    %191 = arith.mulf %190, %187 : vector<16x16xf32>
    %192 = arith.select %189, %187, %191 : vector<16x16xi1>, vector<16x16xf32>
    %cst_113 = arith.constant dense<0xFF800000> : vector<16xf32>
    %193 = vector.multi_reduction <maximumf>, %192, %cst_113 [1] : vector<16x16xf32> to vector<16xf32>
    %194 = vector.shape_cast %193 : vector<16xf32> to vector<16x1xf32>
    %cst_114 = arith.constant 0.000000e+00 : f32
    %195 = vector.broadcast %cst_114 : f32 to vector<16x1xf32>
    %196 = arith.maximumf %194, %195 : vector<16x1xf32>
    %197 = vector.broadcast %196 : vector<16x1xf32> to vector<16x16xf32>
    %198 = arith.subf %192, %197 : vector<16x16xf32>
    %199 = math.exp %198 : vector<16x16xf32>
    %cst_115 = arith.constant dense<0.000000e+00> : vector<16xf32>
    %200 = vector.multi_reduction <add>, %199, %cst_115 [1] : vector<16x16xf32> to vector<16xf32>
    %201 = vector.shape_cast %200 : vector<16xf32> to vector<16x1xf32>
    %cst_116 = arith.constant 0.000000e+00 : f32
    %202 = vector.broadcast %cst_116 : f32 to vector<16x1xf32>
    %203 = arith.subf %202, %196 : vector<16x1xf32>
    %204 = math.exp %203 : vector<16x1xf32>
    %cst_117 = arith.constant 1.000000e-10 : f32
    %205 = vector.broadcast %cst_117 : f32 to vector<16x1xf32>
    %206 = arith.mulf %205, %204 : vector<16x1xf32>
    %207 = arith.addf %201, %206 : vector<16x1xf32>
    %208 = tpu.reciprocal %207 {approx = true} : vector<16x1xf32> -> vector<16x1xf32>
    %209 = arith.truncf %199 : vector<16x16xf32> to vector<16x16xbf16>
    %210 = arith.truncf %167 : vector<16x16xf32> to vector<16x16xbf16>
    %cst_118 = arith.constant dense<0.000000e+00> : vector<16x16xf32>
    %211 = tpu.matmul %209, %210, %cst_118 {dimension_numbers = #tpu.dot_dimension_numbers<[1], [0], [0], [1], [0, 0, 1, 1], [], []>} : vector<16x16xbf16>, vector<16x16xbf16>, vector<16x16xf32> -> vector<16x16xf32>
    %212 = vector.broadcast %208 : vector<16x1xf32> to vector<16x16xf32>
    %213 = arith.mulf %211, %212 : vector<16x16xf32>
    %214 = arith.addf %213, %167 : vector<16x16xf32>
    %cst_119 = arith.constant 0.000000e+00 : f32
    %215 = vector.broadcast %cst_119 : f32 to vector<16x16xf32>
    %216 = arith.cmpf ogt, %214, %215 : vector<16x16xf32>
    %cst_120 = arith.constant 0.000000e+00 : f32
    %217 = vector.broadcast %cst_120 : f32 to vector<16x16xf32>
    %218 = arith.minimumf %214, %217 : vector<16x16xf32>
    %219 = math.exp %218 : vector<16x16xf32>
    %cst_121 = arith.constant 1.000000e+00 : f32
    %220 = vector.broadcast %cst_121 : f32 to vector<16x16xf32>
    %221 = arith.subf %219, %220 : vector<16x16xf32>
    %222 = arith.select %216, %214, %221 : vector<16x16xi1>, vector<16x16xf32>
    %c0_122 = arith.constant 0 : index
    %c0_123 = arith.constant 0 : index
    %223 = vector.load %arg7[%c0_122, %c0_123] : memref<16x32xf32, #tpu.memory_space<vmem>>, vector<16x16xf32>
    tpu.vector_store %arg7[%c0_122, %c0_123], %222 {strides = array<i32>} : memref<16x32xf32, #tpu.memory_space<vmem>>, vector<16x16xf32>,
    %c3_i32_124 = arith.constant 3 : i32
    %c1_i32_125 = arith.constant 1 : i32
    %c1_i32_126 = arith.constant 1 : i32
    %c0_i32_127 = arith.constant 0 : i32
    %c0_i32_128 = arith.constant 0 : i32
    %224 = tpu.memref_slice %arg5[%c3_i32_124, %c0_i32_127, %c0_i32_128] : memref<5x16x16xbf16, #tpu.memory_space<any>> -> memref<1x16x16xbf16, #tpu.memory_space<any>>
    %225 = tpu.memref_squeeze %224 : memref<1x16x16xbf16, #tpu.memory_space<any>> -> memref<16x16xbf16, #tpu.memory_space<any>>
    %c0_i32_129 = arith.constant 0 : i32
    %c0_i32_130 = arith.constant 0 : i32
    %226 = tpu.memref_slice %arg8[%c1_i32_125, %c0_i32_129, %c0_i32_130] : memref<2x16x16xbf16, #tpu.memory_space<vmem>> -> memref<1x16x16xbf16, #tpu.memory_space<vmem>>
    %227 = tpu.memref_squeeze %226 : memref<1x16x16xbf16, #tpu.memory_space<vmem>> -> memref<16x16xbf16, #tpu.memory_space<vmem>>
    %228 = tpu.memref_slice %arg9[%c1_i32_126] : memref<2x!tpu.dma_semaphore, #tpu.memory_space<semaphore_mem>> -> memref<1x!tpu.dma_semaphore, #tpu.memory_space<semaphore_mem>>
    %229 = tpu.memref_squeeze %228 : memref<1x!tpu.dma_semaphore, #tpu.memory_space<semaphore_mem>> -> memref<!tpu.dma_semaphore, #tpu.memory_space<semaphore_mem>>
    tpu.wait_dma2 semaphore(%229 : memref<!tpu.dma_semaphore, #tpu.memory_space<semaphore_mem>>) src(%225 : memref<16x16xbf16, #tpu.memory_space<any>>) dst(%227 : memref<16x16xbf16, #tpu.memory_space<vmem>>)
    %c4_i32 = arith.constant 4 : i32
    %c0_i32_131 = arith.constant 0 : i32
    %c0_i32_132 = arith.constant 0 : i32
    %c0_i32_133 = arith.constant 0 : i32
    %c0_i32_134 = arith.constant 0 : i32
    %230 = tpu.memref_slice %arg5[%c4_i32, %c0_i32_133, %c0_i32_134] : memref<5x16x16xbf16, #tpu.memory_space<any>> -> memref<1x16x16xbf16, #tpu.memory_space<any>>
    %231 = tpu.memref_squeeze %230 : memref<1x16x16xbf16, #tpu.memory_space<any>> -> memref<16x16xbf16, #tpu.memory_space<any>>
    %c0_i32_135 = arith.constant 0 : i32
    %c0_i32_136 = arith.constant 0 : i32
    %232 = tpu.memref_slice %arg8[%c0_i32_131, %c0_i32_135, %c0_i32_136] : memref<2x16x16xbf16, #tpu.memory_space<vmem>> -> memref<1x16x16xbf16, #tpu.memory_space<vmem>>
    %233 = tpu.memref_squeeze %232 : memref<1x16x16xbf16, #tpu.memory_space<vmem>> -> memref<16x16xbf16, #tpu.memory_space<vmem>>
    %234 = tpu.memref_slice %arg9[%c0_i32_132] : memref<2x!tpu.dma_semaphore, #tpu.memory_space<semaphore_mem>> -> memref<1x!tpu.dma_semaphore, #tpu.memory_space<semaphore_mem>>
    %235 = tpu.memref_squeeze %234 : memref<1x!tpu.dma_semaphore, #tpu.memory_space<semaphore_mem>> -> memref<!tpu.dma_semaphore, #tpu.memory_space<semaphore_mem>>
    tpu.enqueue_dma source(%231 : memref<16x16xbf16, #tpu.memory_space<any>>) target(%233 : memref<16x16xbf16, #tpu.memory_space<vmem>>) target_semaphore(%235 : memref<!tpu.dma_semaphore, #tpu.memory_space<semaphore_mem>>)
    %236 = vector.extract_strided_slice %154 {offsets = [0, 16], sizes = [16, 16], strides = [1, 1]} : vector<16x32xf32> to vector<16x16xf32>
    %c3 = arith.constant 3 : index
    %c0_137 = arith.constant 0 : index
    %c0_138 = arith.constant 0 : index
    %237 = vector.load %arg3[%c3, %c0_137, %c0_138] : memref<5x1x16xf32, #tpu.memory_space<vmem>>, vector<1x1x16xf32>
    %238 = vector.shape_cast %237 : vector<1x1x16xf32> to vector<1x16xf32>
    %239 = vector.broadcast %238 : vector<1x16xf32> to vector<16x16xf32>
    %240 = arith.mulf %236, %239 : vector<16x16xf32>
    %cst_139 = arith.constant dense<0.000000e+00> : vector<16xf32>
    %241 = vector.multi_reduction <add>, %240, %cst_139 [1] : vector<16x16xf32> to vector<16xf32>
    %242 = vector.shape_cast %241 : vector<16xf32> to vector<16x1xf32>
    %c3_140 = arith.constant 3 : index
    %c0_141 = arith.constant 0 : index
    %c0_142 = arith.constant 0 : index
    %243 = vector.load %arg4[%c3_140, %c0_141, %c0_142] : memref<5x1x16xf32, #tpu.memory_space<vmem>>, vector<1x1x16xf32>
    %244 = vector.shape_cast %243 : vector<1x1x16xf32> to vector<1x16xf32>
    %245 = vector.broadcast %244 : vector<1x16xf32> to vector<16x16xf32>
    %246 = arith.mulf %236, %245 : vector<16x16xf32>
    %cst_143 = arith.constant dense<0.000000e+00> : vector<16xf32>
    %247 = vector.multi_reduction <add>, %246, %cst_143 [1] : vector<16x16xf32> to vector<16xf32>
    %248 = vector.shape_cast %247 : vector<16xf32> to vector<16x1xf32>
    %c1_144 = arith.constant 1 : index
    %c0_145 = arith.constant 0 : index
    %c0_146 = arith.constant 0 : index
    %249 = vector.load %arg8[%c1_144, %c0_145, %c0_146] : memref<2x16x16xbf16, #tpu.memory_space<vmem>>, vector<1x16x16xbf16>
    %250 = vector.shape_cast %249 : vector<1x16x16xbf16> to vector<16x16xbf16>
    %251 = arith.extf %250 : vector<16x16xbf16> to vector<16x16xf32>
    %252 = tpu.transpose %248, [1, 0] : vector<16x1xf32> -> vector<1x16xf32>
    %253 = vector.broadcast %242 : vector<16x1xf32> to vector<16x16xf32>
    %254 = vector.broadcast %252 : vector<1x16xf32> to vector<16x16xf32>
    %255 = arith.addf %253, %254 : vector<16x16xf32>
    %256 = arith.addf %255, %251 : vector<16x16xf32>
    %cst_147 = arith.constant 0.000000e+00 : f32
    %257 = vector.broadcast %cst_147 : f32 to vector<16x16xf32>
    %258 = arith.cmpf ogt, %256, %257 : vector<16x16xf32>
    %cst_148 = arith.constant 2.000000e-01 : f32
    %259 = vector.broadcast %cst_148 : f32 to vector<16x16xf32>
    %260 = arith.mulf %259, %256 : vector<16x16xf32>
    %261 = arith.select %258, %256, %260 : vector<16x16xi1>, vector<16x16xf32>
    %cst_149 = arith.constant dense<0xFF800000> : vector<16xf32>
    %262 = vector.multi_reduction <maximumf>, %261, %cst_149 [1] : vector<16x16xf32> to vector<16xf32>
    %263 = vector.shape_cast %262 : vector<16xf32> to vector<16x1xf32>
    %cst_150 = arith.constant 0.000000e+00 : f32
    %264 = vector.broadcast %cst_150 : f32 to vector<16x1xf32>
    %265 = arith.maximumf %263, %264 : vector<16x1xf32>
    %266 = vector.broadcast %265 : vector<16x1xf32> to vector<16x16xf32>
    %267 = arith.subf %261, %266 : vector<16x16xf32>
    %268 = math.exp %267 : vector<16x16xf32>
    %cst_151 = arith.constant dense<0.000000e+00> : vector<16xf32>
    %269 = vector.multi_reduction <add>, %268, %cst_151 [1] : vector<16x16xf32> to vector<16xf32>
    %270 = vector.shape_cast %269 : vector<16xf32> to vector<16x1xf32>
    %cst_152 = arith.constant 0.000000e+00 : f32
    %271 = vector.broadcast %cst_152 : f32 to vector<16x1xf32>
    %272 = arith.subf %271, %265 : vector<16x1xf32>
    %273 = math.exp %272 : vector<16x1xf32>
    %cst_153 = arith.constant 1.000000e-10 : f32
    %274 = vector.broadcast %cst_153 : f32 to vector<16x1xf32>
    %275 = arith.mulf %274, %273 : vector<16x1xf32>
    %276 = arith.addf %270, %275 : vector<16x1xf32>
    %277 = tpu.reciprocal %276 {approx = true} : vector<16x1xf32> -> vector<16x1xf32>
    %278 = arith.truncf %268 : vector<16x16xf32> to vector<16x16xbf16>
    %279 = arith.truncf %236 : vector<16x16xf32> to vector<16x16xbf16>
    %cst_154 = arith.constant dense<0.000000e+00> : vector<16x16xf32>
    %280 = tpu.matmul %278, %279, %cst_154 {dimension_numbers = #tpu.dot_dimension_numbers<[1], [0], [0], [1], [0, 0, 1, 1], [], []>} : vector<16x16xbf16>, vector<16x16xbf16>, vector<16x16xf32> -> vector<16x16xf32>
    %281 = vector.broadcast %277 : vector<16x1xf32> to vector<16x16xf32>
    %282 = arith.mulf %280, %281 : vector<16x16xf32>
    %283 = arith.addf %282, %236 : vector<16x16xf32>
    %cst_155 = arith.constant 0.000000e+00 : f32
    %284 = vector.broadcast %cst_155 : f32 to vector<16x16xf32>
    %285 = arith.cmpf ogt, %283, %284 : vector<16x16xf32>
    %cst_156 = arith.constant 0.000000e+00 : f32
    %286 = vector.broadcast %cst_156 : f32 to vector<16x16xf32>
    %287 = arith.minimumf %283, %286 : vector<16x16xf32>
    %288 = math.exp %287 : vector<16x16xf32>
    %cst_157 = arith.constant 1.000000e+00 : f32
    %289 = vector.broadcast %cst_157 : f32 to vector<16x16xf32>
    %290 = arith.subf %288, %289 : vector<16x16xf32>
    %291 = arith.select %285, %283, %290 : vector<16x16xi1>, vector<16x16xf32>
    %c0_158 = arith.constant 0 : index
    %c16_159 = arith.constant 16 : index
    %292 = vector.load %arg7[%c0_158, %c16_159] : memref<16x32xf32, #tpu.memory_space<vmem>>, vector<16x16xf32>
    tpu.vector_store %arg7[%c0_158, %c16_159], %291 {strides = array<i32>} : memref<16x32xf32, #tpu.memory_space<vmem>>, vector<16x16xf32>,
    %c0_160 = arith.constant 0 : index
    %c0_161 = arith.constant 0 : index
    %293 = vector.load %arg7[%c0_160, %c0_161] : memref<16x32xf32, #tpu.memory_space<vmem>>, vector<16x32xf32>
    %294 = arith.truncf %293 : vector<16x32xf32> to vector<16x32xbf16>
    %c0_162 = arith.constant 0 : index
    %c0_163 = arith.constant 0 : index
    %295 = vector.load %arg2[%c0_162, %c0_163] : memref<32x16xbf16, #tpu.memory_space<vmem>>, vector<32x16xbf16>
    %cst_164 = arith.constant dense<0.000000e+00> : vector<16x16xf32>
    %296 = tpu.matmul %294, %295, %cst_164 {dimension_numbers = #tpu.dot_dimension_numbers<[1], [0], [0], [1], [0, 0, 1, 1], [], []>} : vector<16x32xbf16>, vector<32x16xbf16>, vector<16x16xf32> -> vector<16x16xf32>
    %c4_i32_165 = arith.constant 4 : i32
    %c0_i32_166 = arith.constant 0 : i32
    %c0_i32_167 = arith.constant 0 : i32
    %c0_i32_168 = arith.constant 0 : i32
    %c0_i32_169 = arith.constant 0 : i32
    %297 = tpu.memref_slice %arg5[%c4_i32_165, %c0_i32_168, %c0_i32_169] : memref<5x16x16xbf16, #tpu.memory_space<any>> -> memref<1x16x16xbf16, #tpu.memory_space<any>>
    %298 = tpu.memref_squeeze %297 : memref<1x16x16xbf16, #tpu.memory_space<any>> -> memref<16x16xbf16, #tpu.memory_space<any>>
    %c0_i32_170 = arith.constant 0 : i32
    %c0_i32_171 = arith.constant 0 : i32
    %299 = tpu.memref_slice %arg8[%c0_i32_166, %c0_i32_170, %c0_i32_171] : memref<2x16x16xbf16, #tpu.memory_space<vmem>> -> memref<1x16x16xbf16, #tpu.memory_space<vmem>>
    %300 = tpu.memref_squeeze %299 : memref<1x16x16xbf16, #tpu.memory_space<vmem>> -> memref<16x16xbf16, #tpu.memory_space<vmem>>
    %301 = tpu.memref_slice %arg9[%c0_i32_167] : memref<2x!tpu.dma_semaphore, #tpu.memory_space<semaphore_mem>> -> memref<1x!tpu.dma_semaphore, #tpu.memory_space<semaphore_mem>>
    %302 = tpu.memref_squeeze %301 : memref<1x!tpu.dma_semaphore, #tpu.memory_space<semaphore_mem>> -> memref<!tpu.dma_semaphore, #tpu.memory_space<semaphore_mem>>
    tpu.wait_dma2 semaphore(%302 : memref<!tpu.dma_semaphore, #tpu.memory_space<semaphore_mem>>) src(%298 : memref<16x16xbf16, #tpu.memory_space<any>>) dst(%300 : memref<16x16xbf16, #tpu.memory_space<vmem>>)
    %c4 = arith.constant 4 : index
    %c0_172 = arith.constant 0 : index
    %c0_173 = arith.constant 0 : index
    %303 = vector.load %arg3[%c4, %c0_172, %c0_173] : memref<5x1x16xf32, #tpu.memory_space<vmem>>, vector<1x1x16xf32>
    %304 = vector.shape_cast %303 : vector<1x1x16xf32> to vector<1x16xf32>
    %305 = vector.broadcast %304 : vector<1x16xf32> to vector<16x16xf32>
    %306 = arith.mulf %296, %305 : vector<16x16xf32>
    %cst_174 = arith.constant dense<0.000000e+00> : vector<16xf32>
    %307 = vector.multi_reduction <add>, %306, %cst_174 [1] : vector<16x16xf32> to vector<16xf32>
    %308 = vector.shape_cast %307 : vector<16xf32> to vector<16x1xf32>
    %c4_175 = arith.constant 4 : index
    %c0_176 = arith.constant 0 : index
    %c0_177 = arith.constant 0 : index
    %309 = vector.load %arg4[%c4_175, %c0_176, %c0_177] : memref<5x1x16xf32, #tpu.memory_space<vmem>>, vector<1x1x16xf32>
    %310 = vector.shape_cast %309 : vector<1x1x16xf32> to vector<1x16xf32>
    %311 = vector.broadcast %310 : vector<1x16xf32> to vector<16x16xf32>
    %312 = arith.mulf %296, %311 : vector<16x16xf32>
    %cst_178 = arith.constant dense<0.000000e+00> : vector<16xf32>
    %313 = vector.multi_reduction <add>, %312, %cst_178 [1] : vector<16x16xf32> to vector<16xf32>
    %314 = vector.shape_cast %313 : vector<16xf32> to vector<16x1xf32>
    %c0_179 = arith.constant 0 : index
    %c0_180 = arith.constant 0 : index
    %c0_181 = arith.constant 0 : index
    %315 = vector.load %arg8[%c0_179, %c0_180, %c0_181] : memref<2x16x16xbf16, #tpu.memory_space<vmem>>, vector<1x16x16xbf16>
    %316 = vector.shape_cast %315 : vector<1x16x16xbf16> to vector<16x16xbf16>
    %317 = arith.extf %316 : vector<16x16xbf16> to vector<16x16xf32>
    %318 = tpu.transpose %314, [1, 0] : vector<16x1xf32> -> vector<1x16xf32>
    %319 = vector.broadcast %308 : vector<16x1xf32> to vector<16x16xf32>
    %320 = vector.broadcast %318 : vector<1x16xf32> to vector<16x16xf32>
    %321 = arith.addf %319, %320 : vector<16x16xf32>
    %322 = arith.addf %321, %317 : vector<16x16xf32>
    %cst_182 = arith.constant 0.000000e+00 : f32
    %323 = vector.broadcast %cst_182 : f32 to vector<16x16xf32>
    %324 = arith.cmpf ogt, %322, %323 : vector<16x16xf32>
    %cst_183 = arith.constant 2.000000e-01 : f32
    %325 = vector.broadcast %cst_183 : f32 to vector<16x16xf32>
    %326 = arith.mulf %325, %322 : vector<16x16xf32>
    %327 = arith.select %324, %322, %326 : vector<16x16xi1>, vector<16x16xf32>
    %cst_184 = arith.constant dense<0xFF800000> : vector<16xf32>
    %328 = vector.multi_reduction <maximumf>, %327, %cst_184 [1] : vector<16x16xf32> to vector<16xf32>
    %329 = vector.shape_cast %328 : vector<16xf32> to vector<16x1xf32>
    %cst_185 = arith.constant 0.000000e+00 : f32
    %330 = vector.broadcast %cst_185 : f32 to vector<16x1xf32>
    %331 = arith.maximumf %329, %330 : vector<16x1xf32>
    %332 = vector.broadcast %331 : vector<16x1xf32> to vector<16x16xf32>
    %333 = arith.subf %327, %332 : vector<16x16xf32>
    %334 = math.exp %333 : vector<16x16xf32>
    %cst_186 = arith.constant dense<0.000000e+00> : vector<16xf32>
    %335 = vector.multi_reduction <add>, %334, %cst_186 [1] : vector<16x16xf32> to vector<16xf32>
    %336 = vector.shape_cast %335 : vector<16xf32> to vector<16x1xf32>
    %cst_187 = arith.constant 0.000000e+00 : f32
    %337 = vector.broadcast %cst_187 : f32 to vector<16x1xf32>
    %338 = arith.subf %337, %331 : vector<16x1xf32>
    %339 = math.exp %338 : vector<16x1xf32>
    %cst_188 = arith.constant 1.000000e-10 : f32
    %340 = vector.broadcast %cst_188 : f32 to vector<16x1xf32>
    %341 = arith.mulf %340, %339 : vector<16x1xf32>
    %342 = arith.addf %336, %341 : vector<16x1xf32>
    %343 = tpu.reciprocal %342 {approx = true} : vector<16x1xf32> -> vector<16x1xf32>
    %344 = arith.truncf %334 : vector<16x16xf32> to vector<16x16xbf16>
    %345 = arith.truncf %296 : vector<16x16xf32> to vector<16x16xbf16>
    %cst_189 = arith.constant dense<0.000000e+00> : vector<16x16xf32>
    %346 = tpu.matmul %344, %345, %cst_189 {dimension_numbers = #tpu.dot_dimension_numbers<[1], [0], [0], [1], [0, 0, 1, 1], [], []>} : vector<16x16xbf16>, vector<16x16xbf16>, vector<16x16xf32> -> vector<16x16xf32>
    %347 = vector.broadcast %343 : vector<16x1xf32> to vector<16x16xf32>
    %348 = arith.mulf %346, %347 : vector<16x16xf32>
    %349 = arith.addf %348, %296 : vector<16x16xf32>
    %cst_190 = arith.constant 0.000000e+00 : f32
    %350 = vector.broadcast %cst_190 : f32 to vector<16x112xf32>
    %351 = tpu.concatenate %349, %350 in 1 : vector<16x16xf32>, vector<16x112xf32> -> vector<16x128xf32>
    %c0_191 = arith.constant 0 : index
    %c0_192 = arith.constant 0 : index
    %352 = vector.load %arg6[%c0_191, %c0_192] : memref<16x128xf32, #tpu.memory_space<vmem>>, vector<16x128xf32>
    tpu.vector_store %arg6[%c0_191, %c0_192], %351 {strides = array<i32>} : memref<16x128xf32, #tpu.memory_space<vmem>>, vector<16x128xf32>,
    return
  }
}

</mosaic_0001>

<bundles_post_ra>
// kernel: graph_model_forward.1
= control target key start
LH: loop header
LB: loop body
LE: loop exit
PB: predicated region body
PF: predicated region fallthrough
CT: control target
= control target key end

     0   :  { %s1987_s0 = inlined_call_operand.vmem [shape: f32[16,16], index: 0, kind: input, shape index: {}]   ;;  %s1988_s1 = inlined_call_operand.vmem [shape: bf16[2,32,32], index: 1, kind: input, shape index: {}]   ;;  %s1989_s2 = inlined_call_operand.vmem [shape: bf16[32,16], index: 2, kind: input, shape index: {}]   ;;  %s1990_s3 = inlined_call_operand.vmem [shape: f32[5,1,16], index: 3, kind: input, shape index: {}]   ;;  %s1991_s4 = inlined_call_operand.vmem [shape: f32[5,1,16], index: 4, kind: input, shape index: {}]   ;;  %s1992_s5 = inlined_call_operand.vmem [shape: bf16[5,16,16], index: 5, kind: input, shape index: {}]   ;;  %s1993_s6 = inlined_call_operand.vmem [shape: f32[16,128], index: 6, kind: output, shape index: {}]  }
   0x1   :  { %v55_v0 = vld [vmem:[%s1992_s5] sm:$0xff] }
   0x2   :  { %64 = vsyncadd [#allocation4], 128  ;;  %v1600_v1 = vld [vmem:[%s1988_s1] sm:$0xff]   ;;  %v1691_v2 = vmov 0.0   ;;  %v66_v4 = vld [vmem:[%s1987_s0 + $0x8] sm:$0xff]  ;;  %vm1692_vm0 = vmmov 0  }
   0x3   :  { %1544 = vmatprep.subr.bf16.mxu0 %v1691_v2  ;;  %v65_v3 = vld [vmem:[%s1987_s0] sm:$0xff]  ;;  %1546 = vmatprep.mubr.msk.bf16.mxu0 %vm1692_vm0, %v1691_v2  ;;  %vm76_vm1 = vcmask 130048  }
   0x4   :  { %1545 = vmatpush3.bf16.msra.mxu0 %v1600_v1  ;;  %v67_v5 = vpack.c.bf16 %v66_v4, %v65_v3 }
   0x7   :  { %1547 = vmatmul.mubr.msk.bf16.vlgmr.msra.gmra.mxu0 %vm76_vm1, %v67_v5 }
  0xc7   :  { %v1746_v6 = vpop.f32.mrf.mxu0 }
  0xc9   :  { %v1548_v7 = vpop.f32.mrf.mxu0 }
  0xcb   :  { %v1748_v8 = vpop.f32.mrf.mxu0 }
  0xcd   :  { %v1549_v9 = vpop.f32.mrf.mxu0 }
  0xce   :  { %1681 = dma.done.wait [#allocation4], 128 }
  0xcf   :  { %1682 = vsyncadd [#allocation4], 4294967168  ;;  %v1753_v10 = vld [vmem:[%s1992_s5 + $0x8] sm:$0xff]  ;;  %v1458_v11 = vld [vmem:[%s1991_s4] ss:$0 sm:$0xff] }
  0xd0   :  { %v1457_v12 = vld [vmem:[%s1990_s3] ss:$0 sm:$0xff] }
  0xd1   :  { %170 = vsyncadd [#allocation4 + $0x1], 128  ;;  %1550 = vmatprep.subr.bf16.mxu1 %v1691_v2  ;;  %1552 = vmatprep.mubr.msk.bf16.mxu1 %vm1692_vm0, %v1691_v2  ;;  %v193_v13 = vmul.f32 %v1458_v11, %v1746_v6  ;;  %v194_v14 = vmul.f32 %v1458_v11, %v1748_v8  ;;  %v178_v15 = vmul.f32 %v1457_v12, %v1746_v6  ;;  %v237_v23 = vlaneseq }
  0xd2   :  { %v179_v16 = vmul.f32 %v1457_v12, %v1748_v8  ;;  %v1508_v29 = vunpack.c.l.bf16 %v55_v0  ;;  %v1509_v31 = vunpack.c.h.bf16 %v55_v0  ;;  %v1779_v42 = vpack.c.bf16 %v1748_v8, %v1746_v6 }
  0xd3   :  { %v195_v17 = vsel %vm76_vm1, %v193_v13, 0.0  ;;  %v180_v18 = vsel %vm76_vm1, %v178_v15, 0.0  ;;  %v198_v19 = vsel %vm76_vm1, %v194_v14, 0.0  ;;  %v238_v24 = vshrl.u32 %v237_v23, 7 }
  0xd4   :  { %196 = vadd.xlane.f32.xlu0 %v195_v17  ;;  %181 = vadd.xlane.f32.xlu1 %v180_v18  ;;  %v183_v20 = vsel %vm76_vm1, %v179_v16, 0.0 }
  0xd5   :  { %v1772_v26 = vsub.s32 0, %v238_v24  ;;  %1551 = vmatpush3.bf16.msra.mxu1 %v1779_v42 }
  0xd8   :  { %199 = vadd.xlane.f32.xlu0 %v198_v19  ;;  %184 = vadd.xlane.f32.xlu1 %v183_v20 }
 0x15d   :  { %v197_v21 = vpop.xlane.xlu0 %196  ;;  %v182_v25 = vpop.xlane.xlu1 %181 }
 0x15e   :  { %205 = vxpose.xlu0.b32.start [1/2] (short) (narrow) %v197_v21, 8 }
 0x161   :  { %v200_v22 = vpop.xlane.xlu0 %199  ;;  %v185_v28 = vpop.xlane.xlu1 %184 }
 0x162   :  { %206 = vxpose.xlu0.b32.end [2/2] (short) (narrow) %v200_v22, 8 }
 0x1da   :  { %v221_v27 = vpop.trf.xlu0 }
 0x1db   :  { %v240_v30 = vrot.slane %v221_v27, %v1772_v26 }
 0x1dd   :  { %v241_v32 = vadd.f32 %v240_v30, %v182_v25  ;;  %v242_v33 = vadd.f32 %v240_v30, %v185_v28 }
 0x1df   :  { %v243_v34 = vadd.f32 %v1508_v29, %v241_v32  ;;  %v244_v35 = vadd.f32 %v1509_v31, %v242_v33 }
 0x1e1   :  { %vm245_vm2 = vcmp.gt.f32.partialorder %v243_v34, 0.0  ;;  %v247_v36 = vmul.f32 0.2, %v243_v34  ;;  %v248_v37 = vmul.f32 0.2, %v244_v35  ;;  %vm246_vm3 = vcmp.gt.f32.partialorder %v244_v35, 0.0 }
 0x1e3   :  { %v249_v38 = vsel %vm245_vm2, %v243_v34, %v247_v36  ;;  %v250_v40 = vsel %vm246_vm3, %v244_v35, %v248_v37 }
 0x1e4   :  { %v251_v39 = vsel %vm76_vm1, %v249_v38, -inf  ;;  %v254_v41 = vsel %vm76_vm1, %v250_v40, -inf }
 0x1e5   :  { %252 = vmax.xlane.f32.xlu1 %v251_v39 }
 0x1e9   :  { %255 = vmax.xlane.f32.xlu1 %v254_v41 }
 0x26e   :  { %v253_v43 = vpop.xlane.xlu1 %252 }
 0x26f   :  { %v257_v44 = vmax.f32 %v253_v43, 0.0 }
 0x271   :  { %v259_v45 = vsub.f32 %v249_v38, %v257_v44  ;;  %v271_v56 = vsub.f32 0.0, %v257_v44 }
 0x272   :  { %v256_v46 = vpop.xlane.xlu1 %255 }
 0x273   :  { %v261_v47 = vmul.f32 1.442695, %v259_v45  ;;  %v258_v48 = vmax.f32 %v256_v46, 0.0  ;;  %v273_v57 = vmul.f32 1.442695, %v271_v56 }
 0x275   :  { %1601 = vpow2.f32 %v261_v47  ;;  %v260_v49 = vsub.f32 %v250_v40, %v258_v48  ;;  %v272_v58 = vsub.f32 0.0, %v258_v48 }
 0x277   :  { %v263_v50 = vmul.f32 1.442695, %v260_v49  ;;  %v275_v59 = vmul.f32 1.442695, %v272_v58 }
 0x279   :  { %1603 = vpow2.f32 %v263_v50 }
 0x27a   :  { %1605 = vpow2.f32 %v273_v57 }
 0x27b   :  { %1607 = vpow2.f32 %v275_v59 }
 0x282   :  { %v1602_v51 = vpop.eup %1601 }
 0x283   :  { %v265_v52 = vsel %vm76_vm1, %v1602_v51, 0.0 }
 0x284   :  { %266 = vadd.xlane.f32.xlu1 %v265_v52 }
 0x286   :  { %v1604_v53 = vpop.eup %1603 }
 0x287   :  { %v268_v54 = vsel %vm76_vm1, %v1604_v53, 0.0  ;;  %v283_v55 = vpack.c.bf16 %v1604_v53, %v1602_v51  ;;  %v1606_v60 = vpop.eup %1605 }
 0x288   :  { %269 = vadd.xlane.f32.xlu1 %v268_v54  ;;  %v277_v62 = vmul.f32 1e-10, %v1606_v60  ;;  %v1608_v63 = vpop.eup %1607 }
 0x289   :  { %1553 = vmatmul.mubr.msk.bf16.vlgmr.msra.gmra.mxu1 %vm76_vm1, %v283_v55  ;;  %v278_v3 = vmul.f32 1e-10, %v1608_v63 }
 0x30d   :  { %v267_v61 = vpop.xlane.xlu1 %266 }
 0x30e   :  { %v279_v0 = vadd.f32 %v277_v62, %v267_v61 }
 0x310   :  { %1609 = vrcp.f32 %v279_v0 }
 0x311   :  { %v270_v1 = vpop.xlane.xlu1 %269 }
 0x312   :  { %v280_v4 = vadd.f32 %v278_v3, %v270_v1 }
 0x314   :  { %1611 = vrcp.f32 %v280_v4 }
 0x31d   :  { %v1610_v5 = vpop.eup %1609 }
 0x321   :  { %v1612_v13 = vpop.eup %1611 }
 0x349   :  { %v322_v7 = vpop.f32.mrf.mxu1 }
 0x34a   :  { %v329_v9 = vmul.f32 %v1610_v5, %v322_v7 }
 0x34b   :  { %v1554_v11 = vpop.f32.mrf.mxu1 }
 0x34c   :  { %v331_v12 = vadd.f32 %v329_v9, %v1746_v6 }
 0x34d   :  { %v325_v14 = vpop.f32.mrf.mxu1 }
 0x34e   :  { %v335_v15 = vmin.f32 %v331_v12, 0.0  ;;  %v330_v16 = vmul.f32 %v1612_v13, %v325_v14  ;;  %vm333_vm4 = vcmp.gt.f32.partialorder %v331_v12, 0.0 }
 0x34f   :  { %v1555_v17 = vpop.f32.mrf.mxu1 }
 0x350   :  { %v337_v18 = vmul.f32 1.442695, %v335_v15  ;;  %v332_v19 = vadd.f32 %v330_v16, %v1748_v8 }
 0x352   :  { %1613 = vpow2.f32 %v337_v18  ;;  %v336_v20 = vmin.f32 %v332_v19, 0.0  ;;  %vm334_vm5 = vcmp.gt.f32.partialorder %v332_v19, 0.0 }
 0x354   :  { %v339_v21 = vmul.f32 1.442695, %v336_v20 }
 0x356   :  { %1615 = vpow2.f32 %v339_v21 }
 0x35f   :  { %v1614_v22 = vpop.eup %1613 }
 0x360   :  { %v1460_v23 = vadd.f32 -1.0, %v1614_v22 }
 0x362   :  { %v343_v24 = vsel %vm333_vm4, %v331_v12, %v1460_v23 }
 0x363   :  { %v1616_v25 = vpop.eup %1615  ;;  %345 = vst.msk [vmem:[#allocation2] sm:$0xff] %vm76_vm1, %v343_v24 }
 0x364   :  { %v1461_v27 = vadd.f32 -1.0, %v1616_v25 }
 0x366   :  { %v344_v28 = vsel %vm334_vm5, %v332_v19, %v1461_v27 }
 0x367   :  { %346 = vst.msk [vmem:[#allocation2 + $0x8] sm:$0xff] %vm76_vm1, %v344_v28 }
 0x368   :  { %1683 = dma.done.wait [#allocation4 + $0x1], 128 }
 0x369   :  { %1684 = vsyncadd [#allocation4 + $0x1], 4294967168  ;;  %v1792_v29 = vld [vmem:[%s1992_s5 + $0x10] sm:$0xff]  ;;  %v1467_v30 = vld [vmem:[%s1991_s4 + $0x1] ss:$0 sm:$0xff]  ;;  %1556 = vmatprep.subr.bf16.mxu0 %v1691_v2  ;;  %1558 = vmatprep.mubr.msk.bf16.mxu0 %vm1692_vm0, %v1691_v2  ;;  %s1693_s14 = smov 16  }
 0x36a   :  { %426 = vrot.lane.b32.xlu0 %v1467_v30, %s1693_s14 }
 0x36b   :  { %392 = vsyncadd [#allocation4], 128  ;;  %1562 = vmatprep.subr.bf16.mxu1 %v1691_v2  ;;  %v1465_v31 = vld [vmem:[%s1990_s3 + $0x1] ss:$0 sm:$0xff]  ;;  %1566 = vmatprep.mubr.msk.bf16.mxu1 %vm1692_vm0, %v1691_v2  ;;  %s1694_s17 = smov 112   ;;  %v1512_v51 = vunpack.c.l.bf16 %v1753_v10  ;;  %v1513_v52 = vunpack.c.h.bf16 %v1753_v10  ;;  %vm608_vm10 = vcmask 261248  }
 0x36c   :  { %vm631_vm11 = vcmask 261120  }
 0x36e   :  { %400 = vrot.lane.b32.xlu0 %v1465_v31, %s1693_s14 }
 0x3dc   :  { %v427_v32 = vpop.permute.xlu0 %426 }
 0x3dd   :  { %v429_v33 = vmul.f32 %v427_v32, %v1746_v6  ;;  %v430_v35 = vmul.f32 %v427_v32, %v1748_v8 }
 0x3df   :  { %433 = vrot.lane.b32.xlu1 %v429_v33, %s1694_s17 }
 0x3e0   :  { %v401_v34 = vpop.permute.xlu0 %400 }
 0x3e1   :  { %v403_v36 = vmul.f32 %v401_v34, %v1746_v6  ;;  %v404_v37 = vmul.f32 %v401_v34, %v1748_v8 }
 0x3e3   :  { %435 = vrot.lane.b32.xlu1 %v430_v35, %s1694_s17  ;;  %407 = vrot.lane.b32.xlu0 %v403_v36, %s1694_s17 }
 0x3e7   :  { %409 = vrot.lane.b32.xlu1 %v404_v37, %s1694_s17 }
 0x451   :  { %v434_v38 = vpop.permute.xlu1 %433 }
 0x452   :  { %v439_v39 = vsel %vm76_vm1, %v434_v38, 0.0 }
 0x453   :  { %440 = vadd.xlane.f32.xlu0 %v439_v39 }
 0x455   :  { %v436_v40 = vpop.permute.xlu1 %435  ;;  %v408_v41 = vpop.permute.xlu0 %407 }
 0x456   :  { %v442_v43 = vsel %vm76_vm1, %v436_v40, 0.0  ;;  %v413_v44 = vsel %vm76_vm1, %v408_v41, 0.0 }
 0x457   :  { %443 = vadd.xlane.f32.xlu1 %v442_v43  ;;  %414 = vadd.xlane.f32.xlu0 %v413_v44 }
 0x459   :  { %v410_v45 = vpop.permute.xlu1 %409 }
 0x45a   :  { %v416_v46 = vsel %vm76_vm1, %v410_v45, 0.0 }
 0x45b   :  { %417 = vadd.xlane.f32.xlu0 %v416_v46  ;;  %v1617_v46 = vld [vmem:[%s1988_s1 + $0x18] sm:$0xff]  }
 0x45c   :  { %1563 = vmatpush3.bf16.msra.mxu1 %v1617_v46 }
 0x45d   :  { %1564 = vmatprep.subr.bf16.mxu1 %v1691_v2 }
 0x4dc   :  { %v441_v47 = vpop.xlane.xlu0 %440 }
 0x4dd   :  { %449 = vxpose.xlu1.b32.start [1/2] (short) (narrow) %v441_v47, 8  ;;  %v1618_v47 = vld [vmem:[%s1988_s1 + $0x10] sm:$0xff]  }
 0x4de   :  { %1565 = vmatpush3.bf16.msra.mxu1 %v1618_v47 }
 0x4e0   :  { %v444_v48 = vpop.xlane.xlu1 %443  ;;  %v415_v49 = vpop.xlane.xlu0 %414 }
 0x4e1   :  { %450 = vxpose.xlu1.b32.end [2/2] (short) (narrow) %v444_v48, 8 }
 0x4e4   :  { %v418_v54 = vpop.xlane.xlu0 %417 }
 0x559   :  { %v465_v50 = vpop.trf.xlu1 }
 0x55a   :  { %v484_v53 = vrot.slane %v465_v50, %v1772_v26 }
 0x55c   :  { %v485_v55 = vadd.f32 %v484_v53, %v415_v49  ;;  %v486_v56 = vadd.f32 %v484_v53, %v418_v54 }
 0x55e   :  { %v487_v57 = vadd.f32 %v1512_v51, %v485_v55  ;;  %v488_v58 = vadd.f32 %v1513_v52, %v486_v56 }
 0x560   :  { %vm489_vm6 = vcmp.gt.f32.partialorder %v487_v57, 0.0  ;;  %v491_v59 = vmul.f32 0.2, %v487_v57  ;;  %v492_v60 = vmul.f32 0.2, %v488_v58  ;;  %vm490_vm7 = vcmp.gt.f32.partialorder %v488_v58, 0.0 }
 0x562   :  { %v493_v61 = vsel %vm489_vm6, %v487_v57, %v491_v59  ;;  %v494_v63 = vsel %vm490_vm7, %v488_v58, %v492_v60 }
 0x563   :  { %v495_v62 = vsel %vm76_vm1, %v493_v61, -inf  ;;  %v498_v0 = vsel %vm76_vm1, %v494_v63, -inf }
 0x564   :  { %496 = vmax.xlane.f32.xlu0 %v495_v62 }
 0x568   :  { %499 = vmax.xlane.f32.xlu0 %v498_v0 }
 0x57e   :  { %529 = vrot.lane.b32.xlu0 %v1779_v42, %s1694_s17 }
 0x5ed   :  { %v497_v10 = vpop.xlane.xlu0 %496 }
 0x5ee   :  { %v501_v1 = vmax.f32 %v497_v10, 0.0 }
 0x5f0   :  { %v503_v3 = vsub.f32 %v493_v61, %v501_v1  ;;  %v515_v17 = vsub.f32 0.0, %v501_v1 }
 0x5f1   :  { %v500_v4 = vpop.xlane.xlu0 %499 }
 0x5f2   :  { %v505_v5 = vmul.f32 1.442695, %v503_v3  ;;  %v502_v7 = vmax.f32 %v500_v4, 0.0  ;;  %v517_v18 = vmul.f32 1.442695, %v515_v17 }
 0x5f4   :  { %1619 = vpow2.f32 %v505_v5  ;;  %v504_v9 = vsub.f32 %v494_v63, %v502_v7  ;;  %v516_v19 = vsub.f32 0.0, %v502_v7 }
 0x5f5   :  { %v530_v11 = vpop.permute.xlu0 %529 }
 0x5f6   :  { %v507_v12 = vmul.f32 1.442695, %v504_v9  ;;  %1557 = vmatpush3.bf16.msra.mxu0 %v530_v11  ;;  %v519_v20 = vmul.f32 1.442695, %v516_v19 }
 0x5f8   :  { %1621 = vpow2.f32 %v507_v12 }
 0x5f9   :  { %1623 = vpow2.f32 %v517_v18 }
 0x5fa   :  { %1625 = vpow2.f32 %v519_v20 }
 0x601   :  { %v1620_v13 = vpop.eup %1619 }
 0x602   :  { %v509_v14 = vsel %vm76_vm1, %v1620_v13, 0.0 }
 0x603   :  { %510 = vadd.xlane.f32.xlu0 %v509_v14 }
 0x605   :  { %v1622_v15 = vpop.eup %1621 }
 0x606   :  { %v512_v16 = vsel %vm76_vm1, %v1622_v15, 0.0  ;;  %v527_v42 = vpack.c.bf16 %v1622_v15, %v1620_v13  ;;  %v1624_v21 = vpop.eup %1623 }
 0x607   :  { %513 = vadd.xlane.f32.xlu1 %v512_v16  ;;  %v521_v23 = vmul.f32 1e-10, %v1624_v21  ;;  %v1626_v24 = vpop.eup %1625 }
 0x608   :  { %1559 = vmatmul.mubr.msk.bf16.vlgmr.msra.gmra.mxu0 %vm76_vm1, %v527_v42  ;;  %v522_v28 = vmul.f32 1e-10, %v1626_v24 }
 0x619   :  { %580 = vrot.lane.b32.xlu0 %v1746_v6, %s1694_s17 }
 0x61d   :  { %582 = vrot.lane.b32.xlu0 %v1748_v8, %s1694_s17 }
 0x68c   :  { %v511_v22 = vpop.xlane.xlu0 %510 }
 0x68d   :  { %v523_v25 = vadd.f32 %v521_v23, %v511_v22 }
 0x68f   :  { %1627 = vrcp.f32 %v523_v25 }
 0x690   :  { %v514_v27 = vpop.xlane.xlu1 %513  ;;  %v581_v6 = vpop.permute.xlu0 %580 }
 0x691   :  { %v524_v30 = vadd.f32 %v522_v28, %v514_v27 }
 0x693   :  { %1629 = vrcp.f32 %v524_v30 }
 0x694   :  { %v583_v37 = vpop.permute.xlu0 %582 }
 0x69c   :  { %v1628_v31 = vpop.eup %1627 }
 0x6a0   :  { %v1630_v35 = vpop.eup %1629 }
 0x6c8   :  { %v569_v32 = vpop.f32.mrf.mxu0 }
 0x6c9   :  { %v576_v8 = vmul.f32 %v1628_v31, %v569_v32 }
 0x6ca   :  { %v1560_v33 = vpop.f32.mrf.mxu0 }
 0x6cb   :  { %v586_v34 = vadd.f32 %v581_v6, %v576_v8 }
 0x6cc   :  { %v572_v36 = vpop.f32.mrf.mxu0 }
 0x6cd   :  { %v590_v38 = vmin.f32 %v586_v34, 0.0  ;;  %v577_v39 = vmul.f32 %v1630_v35, %v572_v36  ;;  %vm588_vm8 = vcmp.gt.f32.partialorder %v586_v34, 0.0 }
 0x6ce   :  { %v1561_v40 = vpop.f32.mrf.mxu0 }
 0x6cf   :  { %v592_v41 = vmul.f32 1.442695, %v590_v38  ;;  %v587_v43 = vadd.f32 %v583_v37, %v577_v39 }
 0x6d1   :  { %1631 = vpow2.f32 %v592_v41  ;;  %v591_v44 = vmin.f32 %v587_v43, 0.0  ;;  %vm589_vm9 = vcmp.gt.f32.partialorder %v587_v43, 0.0 }
 0x6d3   :  { %v594_v45 = vmul.f32 1.442695, %v591_v44 }
 0x6d5   :  { %1633 = vpow2.f32 %v594_v45 }
 0x6de   :  { %v1632_v48 = vpop.eup %1631 }
 0x6df   :  { %v1469_v49 = vadd.f32 -1.0, %v1632_v48 }
 0x6e1   :  { %v598_v50 = vsel %vm588_vm8, %v586_v34, %v1469_v49 }
 0x6e2   :  { %v1634_v51 = vpop.eup %1633  ;;  %602 = vrot.lane.b32.xlu0 %v598_v50, %s1693_s14 }
 0x6e3   :  { %v1470_v52 = vadd.f32 -1.0, %v1634_v51 }
 0x6e5   :  { %v599_v53 = vsel %vm589_vm9, %v587_v43, %v1470_v52 }
 0x6e6   :  { %604 = vrot.lane.b32.xlu0 %v599_v53, %s1693_s14 }
 0x754   :  { %v603_v54 = vpop.permute.xlu0 %602 }
 0x755   :  { %609 = vst.msk [vmem:[#allocation2] sm:$0xff] %vm608_vm10, %v603_v54 }
 0x758   :  { %v605_v55 = vpop.permute.xlu0 %604 }
 0x759   :  { %610 = vst.msk [vmem:[#allocation2 + $0x8] sm:$0xff] %vm608_vm10, %v605_v55 }
 0x75c   :  { %v611_v56 = vld [vmem:[#allocation2] sm:$0xff] }
 0x760   :  { %v612_v57 = vld [vmem:[#allocation2 + $0x8] sm:$0xff] }
 0x761   :  { %v613_v58 = vpack.c.bf16 %v612_v57, %v611_v56 }
 0x763   :  { %1567 = vmatmul.mubr.msk.bf16.vlgmr.msra.gmra.mxu1 %vm631_vm11, %v613_v58 }
 0x823   :  { %v1846_v59 = vpop.f32.mrf.mxu1 }
 0x825   :  { %v1568_v60 = vpop.f32.mrf.mxu1 }
 0x827   :  { %v1848_v61 = vpop.f32.mrf.mxu1 }
 0x829   :  { %v1569_v62 = vpop.f32.mrf.mxu1 }
 0x82a   :  { %1685 = dma.done.wait [#allocation4], 128 }
 0x82b   :  { %1686 = vsyncadd [#allocation4], 4294967168  ;;  %v1853_v63 = vld [vmem:[%s1992_s5 + $0x18] sm:$0xff]  ;;  %v1483_v0 = vld [vmem:[%s1991_s4 + $0x2] ss:$0 sm:$0xff] }
 0x82c   :  { %v1481_v10 = vld [vmem:[%s1990_s3 + $0x2] ss:$0 sm:$0xff] }
 0x82d   :  { %721 = vsyncadd [#allocation4 + $0x1], 128  ;;  %1570 = vmatprep.subr.bf16.mxu0 %v1691_v2  ;;  %1572 = vmatprep.mubr.msk.bf16.mxu0 %vm1692_vm0, %v1691_v2  ;;  %v746_v1 = vmul.f32 %v1483_v0, %v1846_v59  ;;  %v747_v3 = vmul.f32 %v1483_v0, %v1848_v61  ;;  %v730_v4 = vmul.f32 %v1481_v10, %v1846_v59  ;;  %v1516_v17 = vunpack.c.l.bf16 %v1792_v29 }
 0x82e   :  { %v731_v5 = vmul.f32 %v1481_v10, %v1848_v61  ;;  %v1517_v19 = vunpack.c.h.bf16 %v1792_v29  ;;  %v1879_v31 = vpack.c.bf16 %v1848_v61, %v1846_v59 }
 0x82f   :  { %v748_v7 = vsel %vm76_vm1, %v746_v1, 0.0  ;;  %v732_v9 = vsel %vm76_vm1, %v730_v4, 0.0  ;;  %v751_v11 = vsel %vm76_vm1, %v747_v3, 0.0 }
 0x830   :  { %749 = vadd.xlane.f32.xlu0 %v748_v7  ;;  %733 = vadd.xlane.f32.xlu1 %v732_v9  ;;  %v735_v12 = vsel %vm76_vm1, %v731_v5, 0.0 }
 0x831   :  { %1571 = vmatpush3.bf16.msra.mxu0 %v1879_v31 }
 0x834   :  { %752 = vadd.xlane.f32.xlu0 %v751_v11  ;;  %736 = vadd.xlane.f32.xlu1 %v735_v12 }
 0x8b9   :  { %v750_v13 = vpop.xlane.xlu0 %749  ;;  %v734_v15 = vpop.xlane.xlu1 %733 }
 0x8ba   :  { %758 = vxpose.xlu0.b32.start [1/2] (short) (narrow) %v750_v13, 8 }
 0x8bd   :  { %v753_v14 = vpop.xlane.xlu0 %752  ;;  %v737_v42 = vpop.xlane.xlu1 %736 }
 0x8be   :  { %759 = vxpose.xlu0.b32.end [2/2] (short) (narrow) %v753_v14, 8 }
 0x936   :  { %v774_v16 = vpop.trf.xlu0 }
 0x937   :  { %v793_v18 = vrot.slane %v774_v16, %v1772_v26 }
 0x939   :  { %v794_v20 = vadd.f32 %v793_v18, %v734_v15  ;;  %v795_v21 = vadd.f32 %v793_v18, %v737_v42 }
 0x93b   :  { %v796_v22 = vadd.f32 %v1516_v17, %v794_v20  ;;  %v797_v23 = vadd.f32 %v1517_v19, %v795_v21 }
 0x93d   :  { %vm798_vm12 = vcmp.gt.f32.partialorder %v796_v22, 0.0  ;;  %v800_v24 = vmul.f32 0.2, %v796_v22  ;;  %v801_v25 = vmul.f32 0.2, %v797_v23  ;;  %vm799_vm13 = vcmp.gt.f32.partialorder %v797_v23, 0.0 }
 0x93f   :  { %v802_v27 = vsel %vm798_vm12, %v796_v22, %v800_v24  ;;  %v803_v30 = vsel %vm799_vm13, %v797_v23, %v801_v25 }
 0x940   :  { %v804_v28 = vsel %vm76_vm1, %v802_v27, -inf  ;;  %v807_v6 = vsel %vm76_vm1, %v803_v30, -inf }
 0x941   :  { %805 = vmax.xlane.f32.xlu1 %v804_v28 }
 0x945   :  { %808 = vmax.xlane.f32.xlu1 %v807_v6 }
 0x9ca   :  { %v806_v29 = vpop.xlane.xlu1 %805 }
 0x9cb   :  { %v810_v32 = vmax.f32 %v806_v29, 0.0 }
 0x9cd   :  { %v812_v8 = vsub.f32 %v802_v27, %v810_v32  ;;  %v824_v44 = vsub.f32 0.0, %v810_v32 }
 0x9ce   :  { %v809_v33 = vpop.xlane.xlu1 %808 }
 0x9cf   :  { %v814_v34 = vmul.f32 1.442695, %v812_v8  ;;  %v811_v35 = vmax.f32 %v809_v33, 0.0  ;;  %v826_v45 = vmul.f32 1.442695, %v824_v44 }
 0x9d1   :  { %1635 = vpow2.f32 %v814_v34  ;;  %v813_v36 = vsub.f32 %v803_v30, %v811_v35  ;;  %v825_v46 = vsub.f32 0.0, %v811_v35 }
 0x9d3   :  { %v816_v37 = vmul.f32 1.442695, %v813_v36  ;;  %v828_v47 = vmul.f32 1.442695, %v825_v46 }
 0x9d5   :  { %1637 = vpow2.f32 %v816_v37 }
 0x9d6   :  { %1639 = vpow2.f32 %v826_v45 }
 0x9d7   :  { %1641 = vpow2.f32 %v828_v47 }
 0x9de   :  { %v1636_v38 = vpop.eup %1635 }
 0x9df   :  { %v818_v39 = vsel %vm76_vm1, %v1636_v38, 0.0 }
 0x9e0   :  { %819 = vadd.xlane.f32.xlu1 %v818_v39 }
 0x9e2   :  { %v1638_v40 = vpop.eup %1637 }
 0x9e3   :  { %v821_v41 = vsel %vm76_vm1, %v1638_v40, 0.0  ;;  %v836_v43 = vpack.c.bf16 %v1638_v40, %v1636_v38  ;;  %v1640_v48 = vpop.eup %1639 }
 0x9e4   :  { %822 = vadd.xlane.f32.xlu1 %v821_v41  ;;  %v830_v50 = vmul.f32 1e-10, %v1640_v48  ;;  %v1642_v51 = vpop.eup %1641 }
 0x9e5   :  { %1573 = vmatmul.mubr.msk.bf16.vlgmr.msra.gmra.mxu0 %vm76_vm1, %v836_v43  ;;  %v831_v54 = vmul.f32 1e-10, %v1642_v51 }
 0xa69   :  { %v820_v49 = vpop.xlane.xlu1 %819 }
 0xa6a   :  { %v832_v52 = vadd.f32 %v830_v50, %v820_v49 }
 0xa6c   :  { %1643 = vrcp.f32 %v832_v52 }
 0xa6d   :  { %v823_v53 = vpop.xlane.xlu1 %822 }
 0xa6e   :  { %v833_v55 = vadd.f32 %v831_v54, %v823_v53 }
 0xa70   :  { %1645 = vrcp.f32 %v833_v55 }
 0xa79   :  { %v1644_v56 = vpop.eup %1643 }
 0xa7d   :  { %v1646_v0 = vpop.eup %1645 }
 0xaa5   :  { %v875_v57 = vpop.f32.mrf.mxu0 }
 0xaa6   :  { %v882_v58 = vmul.f32 %v1644_v56, %v875_v57 }
 0xaa7   :  { %v1574_v60 = vpop.f32.mrf.mxu0 }
 0xaa8   :  { %v884_v62 = vadd.f32 %v882_v58, %v1846_v59 }
 0xaa9   :  { %v878_v10 = vpop.f32.mrf.mxu0 }
 0xaaa   :  { %v888_v1 = vmin.f32 %v884_v62, 0.0  ;;  %v883_v3 = vmul.f32 %v1646_v0, %v878_v10  ;;  %vm886_vm14 = vcmp.gt.f32.partialorder %v884_v62, 0.0 }
 0xaab   :  { %v1575_v4 = vpop.f32.mrf.mxu0 }
 0xaac   :  { %v890_v5 = vmul.f32 1.442695, %v888_v1  ;;  %v885_v7 = vadd.f32 %v883_v3, %v1848_v61 }
 0xaae   :  { %1647 = vpow2.f32 %v890_v5  ;;  %v889_v9 = vmin.f32 %v885_v7, 0.0  ;;  %vm887_vm15 = vcmp.gt.f32.partialorder %v885_v7, 0.0 }
 0xab0   :  { %v892_v11 = vmul.f32 1.442695, %v889_v9 }
 0xab2   :  { %1649 = vpow2.f32 %v892_v11 }
 0xabb   :  { %v1648_v12 = vpop.eup %1647 }
 0xabc   :  { %v1485_v13 = vadd.f32 -1.0, %v1648_v12 }
 0xabe   :  { %v896_v14 = vsel %vm886_vm14, %v884_v62, %v1485_v13 }
 0xabf   :  { %v1650_v15 = vpop.eup %1649  ;;  %898 = vst.msk [vmem:[#allocation2] sm:$0xff] %vm76_vm1, %v896_v14 }
 0xac0   :  { %v1486_v16 = vadd.f32 -1.0, %v1650_v15 }
 0xac2   :  { %v897_v42 = vsel %vm887_vm15, %v885_v7, %v1486_v16 }
 0xac3   :  { %899 = vst.msk [vmem:[#allocation2 + $0x8] sm:$0xff] %vm76_vm1, %v897_v42 }
 0xac4   :  { %1687 = dma.done.wait [#allocation4 + $0x1], 128 }
 0xac5   :  { %1688 = vsyncadd [#allocation4 + $0x1], 4294967168  ;;  %v1892_v17 = vld [vmem:[%s1992_s5 + $0x20] sm:$0xff] }
 0xac6   :  { %v1492_v18 = vld [vmem:[%s1991_s4 + $0x3] ss:$0 sm:$0xff] }
 0xac7   :  { %945 = vsyncadd [#allocation4], 128  ;;  %1576 = vmatprep.subr.bf16.mxu1 %v1691_v2  ;;  %1578 = vmatprep.mubr.msk.bf16.mxu1 %vm1692_vm0, %v1691_v2  ;;  %v1490_v19 = vld [vmem:[%s1990_s3 + $0x3] ss:$0 sm:$0xff]  ;;  %v1520_v38 = vunpack.c.l.bf16 %v1853_v63  ;;  %v1521_v39 = vunpack.c.h.bf16 %v1853_v63 }
 0xac8   :  { %979 = vrot.lane.b32.xlu0 %v1492_v18, %s1693_s14  ;;  %1582 = vmatprep.subr.bf16.mxu0 %v1691_v2 }
 0xac9   :  { %1586 = vmatprep.mubr.msk.bf16.mxu0 %vm1692_vm0, %v1691_v2 }
 0xacc   :  { %953 = vrot.lane.b32.xlu0 %v1490_v19, %s1693_s14 }
 0xb3a   :  { %v980_v20 = vpop.permute.xlu0 %979 }
 0xb3b   :  { %v982_v21 = vmul.f32 %v980_v20, %v1846_v59  ;;  %v983_v23 = vmul.f32 %v980_v20, %v1848_v61 }
 0xb3d   :  { %986 = vrot.lane.b32.xlu1 %v982_v21, %s1694_s17 }
 0xb3e   :  { %v954_v22 = vpop.permute.xlu0 %953 }
 0xb3f   :  { %v956_v24 = vmul.f32 %v954_v22, %v1846_v59  ;;  %v957_v25 = vmul.f32 %v954_v22, %v1848_v61 }
 0xb41   :  { %988 = vrot.lane.b32.xlu1 %v983_v23, %s1694_s17  ;;  %960 = vrot.lane.b32.xlu0 %v956_v24, %s1694_s17 }
 0xb45   :  { %962 = vrot.lane.b32.xlu1 %v957_v25, %s1694_s17 }
 0xbaf   :  { %v987_v27 = vpop.permute.xlu1 %986 }
 0xbb0   :  { %v992_v28 = vsel %vm76_vm1, %v987_v27, 0.0 }
 0xbb1   :  { %993 = vadd.xlane.f32.xlu0 %v992_v28 }
 0xbb3   :  { %v989_v30 = vpop.permute.xlu1 %988  ;;  %v961_v6 = vpop.permute.xlu0 %960 }
 0xbb4   :  { %v995_v29 = vsel %vm76_vm1, %v989_v30, 0.0  ;;  %v966_v32 = vsel %vm76_vm1, %v961_v6, 0.0 }
 0xbb5   :  { %996 = vadd.xlane.f32.xlu1 %v995_v29  ;;  %967 = vadd.xlane.f32.xlu0 %v966_v32 }
 0xbb7   :  { %v963_v8 = vpop.permute.xlu1 %962 }
 0xbb8   :  { %v969_v33 = vsel %vm76_vm1, %v963_v8, 0.0 }
 0xbb9   :  { %970 = vadd.xlane.f32.xlu0 %v969_v33  ;;  %v1651_v33 = vld [vmem:[%s1989_s2 + $0x8] sm:$0xff]  }
 0xbba   :  { %1583 = vmatpush3.bf16.msra.mxu0 %v1651_v33 }
 0xbbb   :  { %1584 = vmatprep.subr.bf16.mxu0 %v1691_v2 }
 0xc3a   :  { %v994_v34 = vpop.xlane.xlu0 %993 }
 0xc3b   :  { %1002 = vxpose.xlu1.b32.start [1/2] (short) (narrow) %v994_v34, 8  ;;  %v1652_v34 = vld [vmem:[%s1989_s2] sm:$0xff]  }
 0xc3c   :  { %1585 = vmatpush3.bf16.msra.mxu0 %v1652_v34 }
 0xc3e   :  { %v997_v35 = vpop.xlane.xlu1 %996  ;;  %v968_v36 = vpop.xlane.xlu0 %967 }
 0xc3f   :  { %1003 = vxpose.xlu1.b32.end [2/2] (short) (narrow) %v997_v35, 8 }
 0xc42   :  { %v971_v41 = vpop.xlane.xlu0 %970 }
 0xcb7   :  { %v1018_v37 = vpop.trf.xlu1 }
 0xcb8   :  { %v1037_v40 = vrot.slane %v1018_v37, %v1772_v26 }
 0xcba   :  { %v1038_v43 = vadd.f32 %v1037_v40, %v968_v36  ;;  %v1039_v44 = vadd.f32 %v1037_v40, %v971_v41 }
 0xcbc   :  { %v1040_v45 = vadd.f32 %v1520_v38, %v1038_v43  ;;  %v1041_v46 = vadd.f32 %v1521_v39, %v1039_v44 }
 0xcbe   :  { %vm1042_vm2 = vcmp.gt.f32.partialorder %v1040_v45, 0.0  ;;  %v1044_v47 = vmul.f32 0.2, %v1040_v45  ;;  %v1045_v48 = vmul.f32 0.2, %v1041_v46  ;;  %vm1043_vm3 = vcmp.gt.f32.partialorder %v1041_v46, 0.0 }
 0xcc0   :  { %v1046_v49 = vsel %vm1042_vm2, %v1040_v45, %v1044_v47  ;;  %v1047_v51 = vsel %vm1043_vm3, %v1041_v46, %v1045_v48 }
 0xcc1   :  { %v1048_v50 = vsel %vm76_vm1, %v1046_v49, -inf  ;;  %v1051_v52 = vsel %vm76_vm1, %v1047_v51, -inf }
 0xcc2   :  { %1049 = vmax.xlane.f32.xlu0 %v1048_v50 }
 0xcc6   :  { %1052 = vmax.xlane.f32.xlu0 %v1051_v52 }
 0xcdc   :  { %1082 = vrot.lane.b32.xlu0 %v1879_v31, %s1694_s17 }
 0xd4b   :  { %v1050_v63 = vpop.xlane.xlu0 %1049 }
 0xd4c   :  { %v1054_v53 = vmax.f32 %v1050_v63, 0.0 }
 0xd4e   :  { %v1056_v54 = vsub.f32 %v1046_v49, %v1054_v53  ;;  %v1068_v4 = vsub.f32 0.0, %v1054_v53 }
 0xd4f   :  { %v1053_v55 = vpop.xlane.xlu0 %1052 }
 0xd50   :  { %v1058_v56 = vmul.f32 1.442695, %v1056_v54  ;;  %v1055_v57 = vmax.f32 %v1053_v55, 0.0  ;;  %v1070_v5 = vmul.f32 1.442695, %v1068_v4 }
 0xd52   :  { %1653 = vpow2.f32 %v1058_v56  ;;  %v1057_v58 = vsub.f32 %v1047_v51, %v1055_v57  ;;  %v1069_v7 = vsub.f32 0.0, %v1055_v57 }
 0xd53   :  { %v1083_v60 = vpop.permute.xlu0 %1082 }
 0xd54   :  { %v1060_v62 = vmul.f32 1.442695, %v1057_v58  ;;  %1577 = vmatpush3.bf16.msra.mxu1 %v1083_v60  ;;  %v1072_v9 = vmul.f32 1.442695, %v1069_v7 }
 0xd56   :  { %1655 = vpow2.f32 %v1060_v62 }
 0xd57   :  { %1657 = vpow2.f32 %v1070_v5 }
 0xd58   :  { %1659 = vpow2.f32 %v1072_v9 }
 0xd5f   :  { %v1654_v0 = vpop.eup %1653 }
 0xd60   :  { %v1062_v10 = vsel %vm76_vm1, %v1654_v0, 0.0 }
 0xd61   :  { %1063 = vadd.xlane.f32.xlu0 %v1062_v10 }
 0xd63   :  { %v1656_v1 = vpop.eup %1655 }
 0xd64   :  { %v1065_v3 = vsel %vm76_vm1, %v1656_v1, 0.0  ;;  %v1080_v31 = vpack.c.bf16 %v1656_v1, %v1654_v0  ;;  %v1658_v11 = vpop.eup %1657 }
 0xd65   :  { %1066 = vadd.xlane.f32.xlu1 %v1065_v3  ;;  %v1074_v13 = vmul.f32 1e-10, %v1658_v11  ;;  %v1660_v14 = vpop.eup %1659 }
 0xd66   :  { %1579 = vmatmul.mubr.msk.bf16.vlgmr.msra.gmra.mxu1 %vm76_vm1, %v1080_v31  ;;  %v1075_v42 = vmul.f32 1e-10, %v1660_v14 }
 0xd77   :  { %1133 = vrot.lane.b32.xlu0 %v1846_v59, %s1694_s17 }
 0xd7b   :  { %1135 = vrot.lane.b32.xlu0 %v1848_v61, %s1694_s17 }
 0xdea   :  { %v1064_v12 = vpop.xlane.xlu0 %1063 }
 0xdeb   :  { %v1076_v15 = vadd.f32 %v1074_v13, %v1064_v12 }
 0xded   :  { %1661 = vrcp.f32 %v1076_v15 }
 0xdee   :  { %v1067_v16 = vpop.xlane.xlu1 %1066  ;;  %v1134_v59 = vpop.permute.xlu0 %1133 }
 0xdef   :  { %v1077_v18 = vadd.f32 %v1075_v42, %v1067_v16 }
 0xdf1   :  { %1663 = vrcp.f32 %v1077_v18 }
 0xdf2   :  { %v1136_v25 = vpop.permute.xlu0 %1135 }
 0xdfa   :  { %v1662_v19 = vpop.eup %1661 }
 0xdfe   :  { %v1664_v23 = vpop.eup %1663 }
 0xe26   :  { %v1122_v20 = vpop.f32.mrf.mxu1 }
 0xe27   :  { %v1129_v61 = vmul.f32 %v1662_v19, %v1122_v20 }
 0xe28   :  { %v1580_v21 = vpop.f32.mrf.mxu1 }
 0xe29   :  { %v1139_v22 = vadd.f32 %v1134_v59, %v1129_v61 }
 0xe2a   :  { %v1125_v24 = vpop.f32.mrf.mxu1 }
 0xe2b   :  { %v1143_v27 = vmin.f32 %v1139_v22, 0.0  ;;  %v1130_v28 = vmul.f32 %v1664_v23, %v1125_v24  ;;  %vm1141_vm4 = vcmp.gt.f32.partialorder %v1139_v22, 0.0 }
 0xe2c   :  { %v1581_v30 = vpop.f32.mrf.mxu1 }
 0xe2d   :  { %v1145_v6 = vmul.f32 1.442695, %v1143_v27  ;;  %v1140_v29 = vadd.f32 %v1136_v25, %v1130_v28 }
 0xe2f   :  { %1665 = vpow2.f32 %v1145_v6  ;;  %v1144_v32 = vmin.f32 %v1140_v29, 0.0  ;;  %vm1142_vm5 = vcmp.gt.f32.partialorder %v1140_v29, 0.0 }
 0xe31   :  { %v1147_v8 = vmul.f32 1.442695, %v1144_v32 }
 0xe33   :  { %1667 = vpow2.f32 %v1147_v8 }
 0xe3c   :  { %v1666_v35 = vpop.eup %1665 }
 0xe3d   :  { %v1494_v36 = vadd.f32 -1.0, %v1666_v35 }
 0xe3f   :  { %v1151_v37 = vsel %vm1141_vm4, %v1139_v22, %v1494_v36 }
 0xe40   :  { %v1668_v38 = vpop.eup %1667  ;;  %1155 = vrot.lane.b32.xlu0 %v1151_v37, %s1693_s14 }
 0xe41   :  { %v1495_v39 = vadd.f32 -1.0, %v1668_v38 }
 0xe43   :  { %v1152_v40 = vsel %vm1142_vm5, %v1140_v29, %v1495_v39 }
 0xe44   :  { %1157 = vrot.lane.b32.xlu0 %v1152_v40, %s1693_s14 }
 0xeb2   :  { %v1156_v41 = vpop.permute.xlu0 %1155 }
 0xeb3   :  { %1161 = vst.msk [vmem:[#allocation2] sm:$0xff] %vm608_vm10, %v1156_v41 }
 0xeb6   :  { %v1158_v43 = vpop.permute.xlu0 %1157 }
 0xeb7   :  { %1162 = vst.msk [vmem:[#allocation2 + $0x8] sm:$0xff] %vm608_vm10, %v1158_v43 }
 0xeba   :  { %v1163_v44 = vld [vmem:[#allocation2] sm:$0xff] }
 0xebe   :  { %v1164_v45 = vld [vmem:[#allocation2 + $0x8] sm:$0xff] }
 0xebf   :  { %v1165_v46 = vpack.c.bf16 %v1164_v45, %v1163_v44 }
 0xec1   :  { %1587 = vmatmul.mubr.msk.bf16.vlgmr.msra.gmra.mxu0 %vm631_vm11, %v1165_v46 }
 0xf81   :  { %v1946_v47 = vpop.f32.mrf.mxu0 }
 0xf83   :  { %v1588_v48 = vpop.f32.mrf.mxu0 }
 0xf85   :  { %v1948_v49 = vpop.f32.mrf.mxu0 }
 0xf87   :  { %v1589_v50 = vpop.f32.mrf.mxu0 }
 0xf88   :  { %1689 = dma.done.wait [#allocation4], 128 }
 0xf89   :  { %1690 = vsyncadd [#allocation4], 4294967168  ;;  %1590 = vmatprep.subr.bf16.mxu1 %v1691_v2  ;;  %1592 = vmatprep.mubr.msk.bf16.mxu1 %vm1692_vm0, %v1691_v2  ;;  %v1502_v51 = vld [vmem:[%s1991_s4 + $0x4] ss:$0 sm:$0xff]  ;;  %v1524_v3 = vunpack.c.l.bf16 %v1892_v17  ;;  %v1525_v4 = vunpack.c.h.bf16 %v1892_v17 }
 0xf8a   :  { %v1500_v52 = vld [vmem:[%s1990_s3 + $0x4] ss:$0 sm:$0xff]  ;;  %v1252_v63 = vmul.f32 %v1502_v51, %v1946_v47  ;;  %v1253_v53 = vmul.f32 %v1502_v51, %v1948_v49 }
 0xf8b   :  { %v1236_v54 = vmul.f32 %v1500_v52, %v1946_v47  ;;  %v1237_v55 = vmul.f32 %v1500_v52, %v1948_v49 }
 0xf8c   :  { %v1254_v56 = vsel %vm76_vm1, %v1252_v63, 0.0  ;;  %v1257_v57 = vsel %vm76_vm1, %v1253_v53, 0.0 }
 0xf8d   :  { %v1238_v2 = vsel %vm76_vm1, %v1236_v54, 0.0  ;;  %1255 = vadd.xlane.f32.xlu0 %v1254_v56  ;;  %v1241_v58 = vsel %vm76_vm1, %v1237_v55, 0.0 }
 0xf8e   :  { %1239 = vadd.xlane.f32.xlu1 %v1238_v2 }
 0xf91   :  { %1258 = vadd.xlane.f32.xlu0 %v1257_v57 }
 0xf92   :  { %1242 = vadd.xlane.f32.xlu1 %v1241_v58 }
0x1016   :  { %v1256_v60 = vpop.xlane.xlu0 %1255 }
0x1017   :  { %1264 = vxpose.xlu0.b32.start [1/2] (short) (narrow) %v1256_v60, 8  ;;  %v1240_v0 = vpop.xlane.xlu1 %1239 }
0x101a   :  { %v1259_v62 = vpop.xlane.xlu0 %1258 }
0x101b   :  { %1265 = vxpose.xlu0.b32.end [2/2] (short) (narrow) %v1259_v62, 8  ;;  %v1243_v1 = vpop.xlane.xlu1 %1242 }
0x1093   :  { %v1280_v10 = vpop.trf.xlu0 }
0x1094   :  { %v1299_v31 = vrot.slane %v1280_v10, %v1772_v26  ;;  %v1343_v26 = vpack.c.bf16 %v1948_v49, %v1946_v47 }
0x1096   :  { %v1300_v5 = vadd.f32 %v1299_v31, %v1240_v0  ;;  %v1301_v7 = vadd.f32 %v1299_v31, %v1243_v1  ;;  %1591 = vmatpush3.bf16.msra.mxu1 %v1343_v26 }
0x1098   :  { %v1302_v9 = vadd.f32 %v1524_v3, %v1300_v5  ;;  %v1303_v11 = vadd.f32 %v1525_v4, %v1301_v7 }
0x109a   :  { %vm1304_vm0 = vcmp.gt.f32.partialorder %v1302_v9, 0.0  ;;  %v1306_v12 = vmul.f32 0.2, %v1302_v9  ;;  %v1307_v13 = vmul.f32 0.2, %v1303_v11  ;;  %vm1305_vm6 = vcmp.gt.f32.partialorder %v1303_v11, 0.0 }
0x109c   :  { %v1308_v14 = vsel %vm1304_vm0, %v1302_v9, %v1306_v12  ;;  %v1309_v16 = vsel %vm1305_vm6, %v1303_v11, %v1307_v13 }
0x109d   :  { %v1310_v15 = vsel %vm76_vm1, %v1308_v14, -inf  ;;  %v1313_v42 = vsel %vm76_vm1, %v1309_v16, -inf }
0x109e   :  { %1311 = vmax.xlane.f32.xlu1 %v1310_v15 }
0x10a2   :  { %1314 = vmax.xlane.f32.xlu1 %v1313_v42 }
0x1127   :  { %v1312_v17 = vpop.xlane.xlu1 %1311 }
0x1128   :  { %v1316_v18 = vmax.f32 %v1312_v17, 0.0 }
0x112a   :  { %v1318_v59 = vsub.f32 %v1308_v14, %v1316_v18  ;;  %v1330_v30 = vsub.f32 0.0, %v1316_v18 }
0x112b   :  { %v1315_v19 = vpop.xlane.xlu1 %1314 }
0x112c   :  { %v1320_v20 = vmul.f32 1.442695, %v1318_v59  ;;  %v1317_v61 = vmax.f32 %v1315_v19, 0.0  ;;  %v1332_v6 = vmul.f32 1.442695, %v1330_v30 }
0x112e   :  { %1669 = vpow2.f32 %v1320_v20  ;;  %v1319_v21 = vsub.f32 %v1309_v16, %v1317_v61  ;;  %v1331_v29 = vsub.f32 0.0, %v1317_v61 }
0x1130   :  { %v1322_v22 = vmul.f32 1.442695, %v1319_v21  ;;  %v1334_v32 = vmul.f32 1.442695, %v1331_v29 }
0x1132   :  { %1671 = vpow2.f32 %v1322_v22 }
0x1133   :  { %1673 = vpow2.f32 %v1332_v6 }
0x1134   :  { %1675 = vpow2.f32 %v1334_v32 }
0x113b   :  { %v1670_v23 = vpop.eup %1669 }
0x113c   :  { %v1324_v24 = vsel %vm76_vm1, %v1670_v23, 0.0 }
0x113d   :  { %1325 = vadd.xlane.f32.xlu1 %v1324_v24 }
0x113f   :  { %v1672_v25 = vpop.eup %1671 }
0x1140   :  { %v1327_v27 = vsel %vm76_vm1, %v1672_v25, 0.0  ;;  %v1342_v28 = vpack.c.bf16 %v1672_v25, %v1670_v23  ;;  %v1674_v8 = vpop.eup %1673 }
0x1141   :  { %1328 = vadd.xlane.f32.xlu1 %v1327_v27  ;;  %v1336_v34 = vmul.f32 1e-10, %v1674_v8  ;;  %v1676_v35 = vpop.eup %1675 }
0x1142   :  { %1593 = vmatmul.mubr.msk.bf16.vlgmr.msra.gmra.mxu1 %vm76_vm1, %v1342_v28  ;;  %v1337_v38 = vmul.f32 1e-10, %v1676_v35 }
0x11c6   :  { %v1326_v33 = vpop.xlane.xlu1 %1325 }
0x11c7   :  { %v1338_v36 = vadd.f32 %v1336_v34, %v1326_v33 }
0x11c9   :  { %1677 = vrcp.f32 %v1338_v36 }
0x11ca   :  { %v1329_v37 = vpop.xlane.xlu1 %1328 }
0x11cb   :  { %v1339_v39 = vadd.f32 %v1337_v38, %v1329_v37 }
0x11cd   :  { %1679 = vrcp.f32 %v1339_v39 }
0x11d6   :  { %v1678_v40 = vpop.eup %1677 }
0x11da   :  { %v1680_v46 = vpop.eup %1679 }
0x1202   :  { %v1381_v41 = vpop.f32.mrf.mxu1 }
0x1203   :  { %v1388_v43 = vmul.f32 %v1678_v40, %v1381_v41 }
0x1204   :  { %v1594_v44 = vpop.f32.mrf.mxu1 }
0x1205   :  { %v1390_v45 = vadd.f32 %v1388_v43, %v1946_v47 }
0x1206   :  { %v1384_v48 = vpop.f32.mrf.mxu1 }
0x1207   :  { %v1392_v50 = vsel %vm76_vm1, %v1390_v45, 0.0  ;;  %v1389_v51 = vmul.f32 %v1680_v46, %v1384_v48 }
0x1208   :  { %1394 = vst [vmem:[%s1993_s6] sm:$0xff] %v1392_v50  ;;  %v1595_v52 = vpop.f32.mrf.mxu1 }
0x1209   :  { %v1391_v63 = vadd.f32 %v1389_v51, %v1948_v49 }
0x120b   :  { %v1393_v53 = vsel %vm76_vm1, %v1391_v63, 0.0 }
0x120c   :  { %1395 = vst [vmem:[%s1993_s6 + $0x8] sm:$0xff] %v1393_v53 }
0x120d   :  { %1400 = vsyncmov [#allocation4] }
0x1210   :  { %s1401_s16 = vpop.sfrf %1400 }
0x1211   :  { %p1504_p0 = scmp.ne.s32.totalorder %s1401_s16, 0 }
0x1213   :  { %1405 = shalt.err (%p1504_p0)  }
0x1214   :  { %1407 = vsyncmov [#allocation4 + $0x1] }
0x1217   :  { %s1408_s17 = vpop.sfrf %1407 }
0x1218   :  { %p1505_p1 = scmp.ne.s32.totalorder %s1408_s17, 0 }
0x121a   :  { %1412 = shalt.err (%p1505_p1)  }

</bundles_post_ra>
